<compile_context>
chip_gen: v5e
topology: v5e:2x2
jax: 0.10.0
libtpu: 0.0.40
codegen_flags: <defaults>
</compile_context>

<pallas_src>
import numpy as np
import jax
import jax.numpy as jnp
from jax import lax
from jax.experimental import pallas as pl
from jax.experimental.pallas import tpu as pltpu


def _rcu_kernel(x_hbm_ref, xc_ref, w1_ref, b1_ref, w2_ref, b2_ref, o_ref,
                a_ref, sem):
    # x_hbm_ref: (N, H, W, Cp) raw HBM ref (used only for the 2-row halo DMAs)
    # xc_ref   : (1, TH, W, Cp) auto-pipelined row band of raw x (f32)
    # w*_ref   : (9, Cp, Cp) bf16 weights, index k = ky*3 + kx ;  b*_ref: (1, Cp) f32
    # o_ref    : (1, TH, W, Cp)
    # a_ref    : (TH+4, W, Cp) f32 VMEM: relu(x) band with a 2-row halo on each side
    # sem      : DMA semaphores (2,)
    n = pl.program_id(0)
    band = pl.program_id(1)
    nb = pl.num_programs(1)

    _, TH, W, Cp = xc_ref.shape
    r0 = band * TH
    R1 = TH + 2                       # conv1 output rows this band needs

    # ---- start the 2-row halo DMAs; destinations are full rows of a_ref, fully
    # ---- disjoint (different row tiles) from the center stores below. ------------
    @pl.when(band > 0)
    def _():
        pltpu.make_async_copy(x_hbm_ref.at[n, pl.ds(r0 - 2, 2)],
                              a_ref.at[pl.ds(0, 2)], sem.at[0]).start()

    @pl.when(band < nb - 1)
    def _():
        pltpu.make_async_copy(x_hbm_ref.at[n, pl.ds(r0 + TH, 2)],
                              a_ref.at[pl.ds(TH + 2, 2)], sem.at[1]).start()

    # ---- center rows: relu fused into the (aligned, full-row) staging store ------
    a_ref[2:TH + 2] = jnp.maximum(xc_ref[0], 0.0)

    @pl.when(band == 0)                               # image top edge -> zero rows
    def _():
        a_ref[0:2] = jnp.zeros((2, W, Cp), jnp.float32)

    @pl.when(band == nb - 1)                          # image bottom edge -> zero rows
    def _():
        a_ref[TH + 2:TH + 4] = jnp.zeros((2, W, Cp), jnp.float32)

    # ---- wait for halos, then relu them in place (tiny: 2 rows each) -------------
    @pl.when(band > 0)
    def _():
        pltpu.make_async_copy(x_hbm_ref.at[n, pl.ds(r0 - 2, 2)],
                              a_ref.at[pl.ds(0, 2)], sem.at[0]).wait()
        a_ref[0:2] = jnp.maximum(a_ref[0:2], 0.0)

    @pl.when(band < nb - 1)
    def _():
        pltpu.make_async_copy(x_hbm_ref.at[n, pl.ds(r0 + TH, 2)],
                              a_ref.at[pl.ds(TH + 2, 2)], sem.at[1]).wait()
        a_ref[TH + 2:TH + 4] = jnp.maximum(a_ref[TH + 2:TH + 4], 0.0)

    def conv3x3_flat(src, rows, w_ref, b_ref):
        # src: (rows+2, W, Cp) f32, row zero-padding already included.
        # 9 accumulating K=Cp matmuls (bf16 operands, f32 accumulation) fed from three
        # column-shifted views; returns the flat (rows*W, Cp) f32 accumulator (+bias).
        R = rows + 2
        zcol = jnp.zeros((R, 1, Cp), jnp.float32)
        shifted = (jnp.concatenate([zcol, src[:, :W - 1, :]], axis=1),  # tap col c-1
                   src,                                                 # tap col c
                   jnp.concatenate([src[:, 1:, :], zcol], axis=1))      # tap col c+1
        flats = [s.reshape(R * W, Cp).astype(jnp.bfloat16) for s in shifted]
        acc = None
        for dy in range(3):
            for dx in range(3):
                tap = flats[dx][dy * W:(dy + rows) * W]        # contiguous row slice
                p = jnp.dot(tap, w_ref[dy * 3 + dx],
                            preferred_element_type=jnp.float32)
                acc = p if acc is None else acc + p
        return acc + b_ref[...]

    # ---- conv1 (+bias, relu) over the band plus one row above/below --------------
    acc1 = conv3x3_flat(a_ref[...], R1, w1_ref, b1_ref)        # (R1*W, Cp) f32

    # h1 rows that fall outside the image are conv2's zero padding (not relu(b1));
    # mask just those rows with a cheap flat-row index mask (no full-tensor concat).
    fr = lax.broadcasted_iota(jnp.int32, (R1 * W, 1), 0)
    keep = jnp.logical_and(jnp.logical_or(band > 0, fr >= W),
                           jnp.logical_or(band < nb - 1, fr < (R1 - 1) * W))
    h1 = (jnp.maximum(acc1, 0.0) * keep.astype(jnp.float32)).reshape(R1, W, Cp)

    # ---- conv2 (+bias) and residual add -------------------------------------------
    acc2 = conv3x3_flat(h1, TH, w2_ref, b2_ref)                # (TH*W, Cp) f32
    out = acc2.reshape(TH, W, Cp) + xc_ref[0]
    o_ref[0] = out.astype(o_ref.dtype)


def _round_up(v, m):
    return ((v + m - 1) // m) * m


def _vmem_bytes_estimate(TH, W, Cp):
    """Rough per-step VMEM footprint (bytes) for band sizing and the scoped limit."""
    f32, bf16 = 4, 2
    band1 = (TH + 4) * W * Cp          # conv1 input band (incl. halos)
    band2 = (TH + 2) * W * Cp          # conv1 output / conv2 input band
    band0 = TH * W * Cp                # in/out band
    io = 2 * 2 * band0 * f32                                   # x + out, double-buffered
    wts = 2 * 2 * 9 * Cp * Cp * bf16                           # w1, w2 (bf16, dbl-buffered)
    scratch = band1 * f32                                      # relu(x) halo band
    temps = (band1 * (2 * f32 + 3 * bf16)                      # conv1 shifted views + flats
             + band2 * (2 * f32 + 2 * f32 + 3 * bf16)          # acc1/h1 + conv2 views/flats
             + band0 * 2 * f32)                                # acc2 + residual temp
    return io + wts + scratch + temps + (2 << 20)


def _pick_band_rows(H, W, Cp, budget_bytes):
    # Largest divisor of H whose working set fits the budget; TH == 1 is only legal
    # when it is the whole image (the 2-row halo DMAs assume TH >= 2 otherwise).
    cands = [d for d in range(1, H + 1) if H % d == 0 and (d >= 2 or d == H)]
    fitting = [d for d in cands if _vmem_bytes_estimate(d, W, Cp) <= budget_bytes]
    return max(fitting) if fitting else min(cands)


def residual_conv_unit(x_nchw, w1_oihw, b1, w2_oihw, b2, band_rows=None):
    """ResidualConvUnit forward. x_nchw: (N, C, H, W) f32, weights OIHW. Returns NCHW."""
    N, C, H, W = x_nchw.shape
    Cp = _round_up(C, 128)        # lane-dense channels: unmasked stores, full-depth MXU K

    # NCHW -> NHWC (+ zero channel padding; padded channels carry zero weights/biases
    # so they stay exactly zero end-to-end).
    # TODO(synk): keep activations NHWC/Cp across adjacent ops to avoid these
    # wrapper-side transpose/pad/slice HBM passes.
    x_nhwc = jnp.transpose(x_nchw, (0, 2, 3, 1))
    if Cp != C:
        x_nhwc = jnp.pad(x_nhwc, ((0, 0), (0, 0), (0, 0), (0, Cp - C)))

    def prep_w(w_oihw):
        w_hwio = jnp.transpose(w_oihw, (2, 3, 1, 0))          # (ky, kx, Cin, Cout)
        if Cp != C:
            w_hwio = jnp.pad(w_hwio, ((0, 0), (0, 0), (0, Cp - C), (0, Cp - C)))
        return w_hwio.reshape(9, Cp, Cp).astype(jnp.bfloat16)

    def prep_b(b):
        if Cp != C:
            b = jnp.pad(b, (0, Cp - C))
        return b.reshape(1, Cp).astype(jnp.float32)

    w1f, w2f = prep_w(w1_oihw), prep_w(w2_oihw)
    b1f, b2f = prep_b(b1), prep_b(b2)

    try:
        vmem_phys = int(pltpu.get_tpu_info().vmem_capacity_bytes)
    except Exception:
        vmem_phys = 64 * 1024 * 1024                          # v7x-sized conservative fallback

    if band_rows is None:
        TH = _pick_band_rows(H, W, Cp, budget_bytes=int(vmem_phys * 0.4))
    else:
        assert H % band_rows == 0 and (band_rows >= 2 or band_rows == H)
        TH = band_rows
    n_bands = H // TH

    vmem_limit = int(min(0.9 * vmem_phys,
                         max(2 * _vmem_bytes_estimate(TH, W, Cp), 48 * 1024 * 1024)))

    out_nhwc = pl.pallas_call(
        _rcu_kernel,
        out_shape=jax.ShapeDtypeStruct((N, H, W, Cp), x_nchw.dtype),
        grid_spec=pltpu.PrefetchScalarGridSpec(
            num_scalar_prefetch=0,
            grid=(N, n_bands),
            in_specs=[
                pl.BlockSpec(memory_space=pl.ANY),                         # whole x (halo DMAs)
                pl.BlockSpec((1, TH, W, Cp), lambda n, b: (n, b, 0, 0)),   # row band of x
                pl.BlockSpec((9, Cp, Cp), lambda n, b: (0, 0, 0)),         # w1 (bf16, resident)
                pl.BlockSpec((1, Cp), lambda n, b: (0, 0)),                # b1
                pl.BlockSpec((9, Cp, Cp), lambda n, b: (0, 0, 0)),         # w2 (bf16, resident)
                pl.BlockSpec((1, Cp), lambda n, b: (0, 0)),                # b2
            ],
            out_specs=pl.BlockSpec((1, TH, W, Cp), lambda n, b: (n, b, 0, 0)),
            scratch_shapes=[
                pltpu.VMEM((TH + 4, W, Cp), jnp.float32),   # relu(x) band with 2-row halos
                pltpu.SemaphoreType.DMA((2,)),
            ],
        ),
        compiler_params=pltpu.CompilerParams(
            dimension_semantics=("parallel", "parallel"),
            vmem_limit_bytes=vmem_limit,
        ),
    )(x_nhwc, x_nhwc, w1f, b1f, w2f, b2f)

    if Cp != C:
        out_nhwc = out_nhwc[..., :C]
    return jnp.transpose(out_nhwc, (0, 3, 1, 2))


def _reference_forward(x, w1, b1, w2, b2):
    """Pure-JAX NCHW reference matching the PyTorch module."""
    out = jax.nn.relu(x)
    out = lax.conv_general_dilated(
        out, w1, (1, 1), ((1, 1), (1, 1)),
        dimension_numbers=("NCHW", "OIHW", "NCHW")) + b1[None, :, None, None]
    out = jax.nn.relu(out)
    out = lax.conv_general_dilated(
        out, w2, (1, 1), ((1, 1), (1, 1)),
        dimension_numbers=("NCHW", "OIHW", "NCHW")) + b2[None, :, None, None]
    return out + x


if __name__ == "__main__":
    N, C, H, W = 2, 4, 16, 16
    key = jax.random.PRNGKey(0)
    kx, k1, kb1, k2, kb2 = jax.random.split(key, 5)

    x = jax.random.normal(kx, (N, C, H, W), dtype=jnp.float32)

    # Deterministic synthetic parameters (Conv2d(features, features, 3, bias=True) x2).
    fan_in = C * 3 * 3
    bound = 1.0 / np.sqrt(fan_in)
    w1 = jax.random.uniform(k1, (C, C, 3, 3), jnp.float32, -bound, bound)
    b1 = jax.random.uniform(kb1, (C,), jnp.float32, -bound, bound)
    w2 = jax.random.uniform(k2, (C, C, 3, 3), jnp.float32, -bound, bound)
    b2 = jax.random.uniform(kb2, (C,), jnp.float32, -bound, bound)

    ref = jax.block_until_ready(_reference_forward(x, w1, b1, w2, b2))

    # Multi-band path (exercises the halo DMAs and both image-edge zero paths).
    # bf16 MXU operands with f32 accumulation -> compare at bf16-level tolerance.
    out_banded = jax.block_until_ready(
        residual_conv_unit(x, w1, b1, w2, b2, band_rows=4))
    np.testing.assert_allclose(np.asarray(out_banded), np.asarray(ref),
                               rtol=5e-2, atol=5e-2)

    # Auto-tiled path (single band at this toy size).
    out_auto = jax.block_until_ready(residual_conv_unit(x, w1, b1, w2, b2))
    np.testing.assert_allclose(np.asarray(out_auto), np.asarray(ref),
                               rtol=5e-2, atol=5e-2)

    print("KERNEL_OK")
</pallas_src>

<mosaic_0001>
module attributes {stable_mosaic.version = 11 : i64} {
  func.func @_rcu_kernel(%arg0: i32, %arg1: i32, %arg2: memref<2x16x16x128xf32, #tpu.memory_space<any>>, %arg3: memref<1x4x16x128xf32, #tpu.memory_space<vmem>>, %arg4: memref<9x128x128xbf16, #tpu.memory_space<vmem>>, %arg5: memref<1x128xf32, #tpu.memory_space<vmem>>, %arg6: memref<9x128x128xbf16, #tpu.memory_space<vmem>>, %arg7: memref<1x128xf32, #tpu.memory_space<vmem>>, %arg8: memref<1x4x16x128xf32, #tpu.memory_space<vmem>>, %arg9: memref<8x16x128xf32, #tpu.memory_space<vmem>>, %arg10: memref<2x!tpu.dma_semaphore, #tpu.memory_space<semaphore_mem>>) attributes {dimension_semantics = [#tpu.dimension_semantics<parallel>, #tpu.dimension_semantics<parallel>], iteration_bounds = array<i64: 2, 4>, scalar_prefetch = 0 : i64, scratch_operands = 2 : i64, tpu.core_type = #tpu.core_type<tc>, window_params = [{}, {transform_indices = @transform_1, window_bounds = array<i64: 1, 4, 16, 128>}, {pipeline_mode = #tpu.pipeline_mode<synchronous>, transform_indices = @transform_2, window_bounds = array<i64: 9, 128, 128>}, {pipeline_mode = #tpu.pipeline_mode<synchronous>, transform_indices = @transform_3, window_bounds = array<i64: 1, 128>}, {pipeline_mode = #tpu.pipeline_mode<synchronous>, transform_indices = @transform_4, window_bounds = array<i64: 9, 128, 128>}, {pipeline_mode = #tpu.pipeline_mode<synchronous>, transform_indices = @transform_5, window_bounds = array<i64: 1, 128>}, {transform_indices = @transform_6, window_bounds = array<i64: 1, 4, 16, 128>}]} {
    %c4_i32 = arith.constant 4 : i32
    %0 = arith.muli %arg1, %c4_i32 : i32
    %c0_i32 = arith.constant 0 : i32
    %1 = arith.cmpi sgt, %arg1, %c0_i32 : i32
    %2 = arith.extui %1 : i1 to i32
    %c0_i32_0 = arith.constant 0 : i32
    %3 = arith.cmpi ne, %2, %c0_i32_0 : i32
    scf.if %3 {
      %c2_i32 = arith.constant 2 : i32
      %167 = arith.subi %0, %c2_i32 : i32
      %c0_i32_100 = arith.constant 0 : i32
      %c0_i32_101 = arith.constant 0 : i32
      %c0_i32_102 = arith.constant 0 : i32
      %168 = tpu.memref_slice %arg2[%arg0, %167, %c0_i32_101, %c0_i32_102] : memref<2x16x16x128xf32, #tpu.memory_space<any>> -> memref<1x2x16x128xf32, #tpu.memory_space<any>>
      %169 = tpu.memref_squeeze %168 : memref<1x2x16x128xf32, #tpu.memory_space<any>> -> memref<2x16x128xf32, #tpu.memory_space<any>>
      %c0_i32_103 = arith.constant 0 : i32
      %c0_i32_104 = arith.constant 0 : i32
      %c0_i32_105 = arith.constant 0 : i32
      %170 = tpu.memref_slice %arg9[%c0_i32_103, %c0_i32_104, %c0_i32_105] : memref<8x16x128xf32, #tpu.memory_space<vmem>> -> memref<2x16x128xf32, #tpu.memory_space<vmem>>
      %171 = tpu.memref_slice %arg10[%c0_i32_100] : memref<2x!tpu.dma_semaphore, #tpu.memory_space<semaphore_mem>> -> memref<1x!tpu.dma_semaphore, #tpu.memory_space<semaphore_mem>>
      %172 = tpu.memref_squeeze %171 : memref<1x!tpu.dma_semaphore, #tpu.memory_space<semaphore_mem>> -> memref<!tpu.dma_semaphore, #tpu.memory_space<semaphore_mem>>
      tpu.enqueue_dma source(%169 : memref<2x16x128xf32, #tpu.memory_space<any>>) target(%170 : memref<2x16x128xf32, #tpu.memory_space<vmem>>) target_semaphore(%172 : memref<!tpu.dma_semaphore, #tpu.memory_space<semaphore_mem>>)
    } else {
    }
    %c3_i32 = arith.constant 3 : i32
    %4 = arith.cmpi slt, %arg1, %c3_i32 : i32
    %5 = arith.extui %4 : i1 to i32
    %c0_i32_1 = arith.constant 0 : i32
    %6 = arith.cmpi ne, %5, %c0_i32_1 : i32
    scf.if %6 {
      %c4_i32_100 = arith.constant 4 : i32
      %167 = arith.addi %0, %c4_i32_100 : i32
      %c1_i32 = arith.constant 1 : i32
      %c0_i32_101 = arith.constant 0 : i32
      %c0_i32_102 = arith.constant 0 : i32
      %168 = tpu.memref_slice %arg2[%arg0, %167, %c0_i32_101, %c0_i32_102] : memref<2x16x16x128xf32, #tpu.memory_space<any>> -> memref<1x2x16x128xf32, #tpu.memory_space<any>>
      %169 = tpu.memref_squeeze %168 : memref<1x2x16x128xf32, #tpu.memory_space<any>> -> memref<2x16x128xf32, #tpu.memory_space<any>>
      %c6_i32 = arith.constant 6 : i32
      %c0_i32_103 = arith.constant 0 : i32
      %c0_i32_104 = arith.constant 0 : i32
      %170 = tpu.memref_slice %arg9[%c6_i32, %c0_i32_103, %c0_i32_104] : memref<8x16x128xf32, #tpu.memory_space<vmem>> -> memref<2x16x128xf32, #tpu.memory_space<vmem>>
      %171 = tpu.memref_slice %arg10[%c1_i32] : memref<2x!tpu.dma_semaphore, #tpu.memory_space<semaphore_mem>> -> memref<1x!tpu.dma_semaphore, #tpu.memory_space<semaphore_mem>>
      %172 = tpu.memref_squeeze %171 : memref<1x!tpu.dma_semaphore, #tpu.memory_space<semaphore_mem>> -> memref<!tpu.dma_semaphore, #tpu.memory_space<semaphore_mem>>
      tpu.enqueue_dma source(%169 : memref<2x16x128xf32, #tpu.memory_space<any>>) target(%170 : memref<2x16x128xf32, #tpu.memory_space<vmem>>) target_semaphore(%172 : memref<!tpu.dma_semaphore, #tpu.memory_space<semaphore_mem>>)
    } else {
    }
    %c0 = arith.constant 0 : index
    %c0_2 = arith.constant 0 : index
    %c0_3 = arith.constant 0 : index
    %c0_4 = arith.constant 0 : index
    %7 = vector.load %arg3[%c0, %c0_2, %c0_3, %c0_4] : memref<1x4x16x128xf32, #tpu.memory_space<vmem>>, vector<1x4x16x128xf32>
    %8 = vector.shape_cast %7 : vector<1x4x16x128xf32> to vector<4x16x128xf32>
    %cst = arith.constant 0.000000e+00 : f32
    %9 = vector.broadcast %cst : f32 to vector<4x16x128xf32>
    %10 = arith.maximumf %8, %9 : vector<4x16x128xf32>
    %c2 = arith.constant 2 : index
    %c0_5 = arith.constant 0 : index
    %c0_6 = arith.constant 0 : index
    %11 = vector.load %arg9[%c2, %c0_5, %c0_6] : memref<8x16x128xf32, #tpu.memory_space<vmem>>, vector<4x16x128xf32>
    tpu.vector_store %arg9[%c2, %c0_5, %c0_6], %10 {strides = array<i32>} : memref<8x16x128xf32, #tpu.memory_space<vmem>>, vector<4x16x128xf32>,
    %c0_i32_7 = arith.constant 0 : i32
    %12 = arith.cmpi eq, %arg1, %c0_i32_7 : i32
    %13 = arith.extui %12 : i1 to i32
    %c0_i32_8 = arith.constant 0 : i32
    %14 = arith.cmpi ne, %13, %c0_i32_8 : i32
    scf.if %14 {
      %cst_100 = arith.constant 0.000000e+00 : f32
      %167 = vector.broadcast %cst_100 : f32 to vector<2x16x128xf32>
      %c0_101 = arith.constant 0 : index
      %c0_102 = arith.constant 0 : index
      %c0_103 = arith.constant 0 : index
      %168 = vector.load %arg9[%c0_101, %c0_102, %c0_103] : memref<8x16x128xf32, #tpu.memory_space<vmem>>, vector<2x16x128xf32>
      tpu.vector_store %arg9[%c0_101, %c0_102, %c0_103], %167 {strides = array<i32>} : memref<8x16x128xf32, #tpu.memory_space<vmem>>, vector<2x16x128xf32>,
    } else {
    }
    %c3_i32_9 = arith.constant 3 : i32
    %15 = arith.cmpi eq, %arg1, %c3_i32_9 : i32
    %16 = arith.extui %15 : i1 to i32
    %c0_i32_10 = arith.constant 0 : i32
    %17 = arith.cmpi ne, %16, %c0_i32_10 : i32
    scf.if %17 {
      %cst_100 = arith.constant 0.000000e+00 : f32
      %167 = vector.broadcast %cst_100 : f32 to vector<2x16x128xf32>
      %c6_101 = arith.constant 6 : index
      %c0_102 = arith.constant 0 : index
      %c0_103 = arith.constant 0 : index
      %168 = vector.load %arg9[%c6_101, %c0_102, %c0_103] : memref<8x16x128xf32, #tpu.memory_space<vmem>>, vector<2x16x128xf32>
      tpu.vector_store %arg9[%c6_101, %c0_102, %c0_103], %167 {strides = array<i32>} : memref<8x16x128xf32, #tpu.memory_space<vmem>>, vector<2x16x128xf32>,
    } else {
    }
    %c0_i32_11 = arith.constant 0 : i32
    %18 = arith.cmpi sgt, %arg1, %c0_i32_11 : i32
    %19 = arith.extui %18 : i1 to i32
    %c0_i32_12 = arith.constant 0 : i32
    %20 = arith.cmpi ne, %19, %c0_i32_12 : i32
    scf.if %20 {
      %c2_i32 = arith.constant 2 : i32
      %167 = arith.subi %0, %c2_i32 : i32
      %c0_i32_100 = arith.constant 0 : i32
      %c0_i32_101 = arith.constant 0 : i32
      %c0_i32_102 = arith.constant 0 : i32
      %168 = tpu.memref_slice %arg2[%arg0, %167, %c0_i32_101, %c0_i32_102] : memref<2x16x16x128xf32, #tpu.memory_space<any>> -> memref<1x2x16x128xf32, #tpu.memory_space<any>>
      %169 = tpu.memref_squeeze %168 : memref<1x2x16x128xf32, #tpu.memory_space<any>> -> memref<2x16x128xf32, #tpu.memory_space<any>>
      %c0_i32_103 = arith.constant 0 : i32
      %c0_i32_104 = arith.constant 0 : i32
      %c0_i32_105 = arith.constant 0 : i32
      %170 = tpu.memref_slice %arg9[%c0_i32_103, %c0_i32_104, %c0_i32_105] : memref<8x16x128xf32, #tpu.memory_space<vmem>> -> memref<2x16x128xf32, #tpu.memory_space<vmem>>
      %171 = tpu.memref_slice %arg10[%c0_i32_100] : memref<2x!tpu.dma_semaphore, #tpu.memory_space<semaphore_mem>> -> memref<1x!tpu.dma_semaphore, #tpu.memory_space<semaphore_mem>>
      %172 = tpu.memref_squeeze %171 : memref<1x!tpu.dma_semaphore, #tpu.memory_space<semaphore_mem>> -> memref<!tpu.dma_semaphore, #tpu.memory_space<semaphore_mem>>
      tpu.wait_dma2 semaphore(%172 : memref<!tpu.dma_semaphore, #tpu.memory_space<semaphore_mem>>) src(%169 : memref<2x16x128xf32, #tpu.memory_space<any>>) dst(%170 : memref<2x16x128xf32, #tpu.memory_space<vmem>>)
      %c0_106 = arith.constant 0 : index
      %c0_107 = arith.constant 0 : index
      %c0_108 = arith.constant 0 : index
      %173 = vector.load %arg9[%c0_106, %c0_107, %c0_108] : memref<8x16x128xf32, #tpu.memory_space<vmem>>, vector<2x16x128xf32>
      %cst_109 = arith.constant 0.000000e+00 : f32
      %174 = vector.broadcast %cst_109 : f32 to vector<2x16x128xf32>
      %175 = arith.maximumf %173, %174 : vector<2x16x128xf32>
      %c0_110 = arith.constant 0 : index
      %c0_111 = arith.constant 0 : index
      %c0_112 = arith.constant 0 : index
      %176 = vector.load %arg9[%c0_110, %c0_111, %c0_112] : memref<8x16x128xf32, #tpu.memory_space<vmem>>, vector<2x16x128xf32>
      tpu.vector_store %arg9[%c0_110, %c0_111, %c0_112], %175 {strides = array<i32>} : memref<8x16x128xf32, #tpu.memory_space<vmem>>, vector<2x16x128xf32>,
    } else {
    }
    %c3_i32_13 = arith.constant 3 : i32
    %21 = arith.cmpi slt, %arg1, %c3_i32_13 : i32
    %22 = arith.extui %21 : i1 to i32
    %c0_i32_14 = arith.constant 0 : i32
    %23 = arith.cmpi ne, %22, %c0_i32_14 : i32
    scf.if %23 {
      %c4_i32_100 = arith.constant 4 : i32
      %167 = arith.addi %0, %c4_i32_100 : i32
      %c1_i32 = arith.constant 1 : i32
      %c0_i32_101 = arith.constant 0 : i32
      %c0_i32_102 = arith.constant 0 : i32
      %168 = tpu.memref_slice %arg2[%arg0, %167, %c0_i32_101, %c0_i32_102] : memref<2x16x16x128xf32, #tpu.memory_space<any>> -> memref<1x2x16x128xf32, #tpu.memory_space<any>>
      %169 = tpu.memref_squeeze %168 : memref<1x2x16x128xf32, #tpu.memory_space<any>> -> memref<2x16x128xf32, #tpu.memory_space<any>>
      %c6_i32 = arith.constant 6 : i32
      %c0_i32_103 = arith.constant 0 : i32
      %c0_i32_104 = arith.constant 0 : i32
      %170 = tpu.memref_slice %arg9[%c6_i32, %c0_i32_103, %c0_i32_104] : memref<8x16x128xf32, #tpu.memory_space<vmem>> -> memref<2x16x128xf32, #tpu.memory_space<vmem>>
      %171 = tpu.memref_slice %arg10[%c1_i32] : memref<2x!tpu.dma_semaphore, #tpu.memory_space<semaphore_mem>> -> memref<1x!tpu.dma_semaphore, #tpu.memory_space<semaphore_mem>>
      %172 = tpu.memref_squeeze %171 : memref<1x!tpu.dma_semaphore, #tpu.memory_space<semaphore_mem>> -> memref<!tpu.dma_semaphore, #tpu.memory_space<semaphore_mem>>
      tpu.wait_dma2 semaphore(%172 : memref<!tpu.dma_semaphore, #tpu.memory_space<semaphore_mem>>) src(%169 : memref<2x16x128xf32, #tpu.memory_space<any>>) dst(%170 : memref<2x16x128xf32, #tpu.memory_space<vmem>>)
      %c6_105 = arith.constant 6 : index
      %c0_106 = arith.constant 0 : index
      %c0_107 = arith.constant 0 : index
      %173 = vector.load %arg9[%c6_105, %c0_106, %c0_107] : memref<8x16x128xf32, #tpu.memory_space<vmem>>, vector<2x16x128xf32>
      %cst_108 = arith.constant 0.000000e+00 : f32
      %174 = vector.broadcast %cst_108 : f32 to vector<2x16x128xf32>
      %175 = arith.maximumf %173, %174 : vector<2x16x128xf32>
      %c6_109 = arith.constant 6 : index
      %c0_110 = arith.constant 0 : index
      %c0_111 = arith.constant 0 : index
      %176 = vector.load %arg9[%c6_109, %c0_110, %c0_111] : memref<8x16x128xf32, #tpu.memory_space<vmem>>, vector<2x16x128xf32>
      tpu.vector_store %arg9[%c6_109, %c0_110, %c0_111], %175 {strides = array<i32>} : memref<8x16x128xf32, #tpu.memory_space<vmem>>, vector<2x16x128xf32>,
    } else {
    }
    %c0_15 = arith.constant 0 : index
    %c0_16 = arith.constant 0 : index
    %c0_17 = arith.constant 0 : index
    %24 = vector.load %arg9[%c0_15, %c0_16, %c0_17] : memref<8x16x128xf32, #tpu.memory_space<vmem>>, vector<8x16x128xf32>
    %cst_18 = arith.constant 0.000000e+00 : f32
    %25 = vector.broadcast %cst_18 : f32 to vector<8x1x128xf32>
    %26 = vector.extract_strided_slice %24 {offsets = [0, 0, 0], sizes = [8, 15, 128], strides = [1, 1, 1]} : vector<8x16x128xf32> to vector<8x15x128xf32>
    %27 = tpu.concatenate %25, %26 in 1 : vector<8x1x128xf32>, vector<8x15x128xf32> -> vector<8x16x128xf32>
    %28 = vector.extract_strided_slice %24 {offsets = [0, 1, 0], sizes = [8, 15, 128], strides = [1, 1, 1]} : vector<8x16x128xf32> to vector<8x15x128xf32>
    %29 = tpu.concatenate %28, %25 in 1 : vector<8x15x128xf32>, vector<8x1x128xf32> -> vector<8x16x128xf32>
    %30 = vector.shape_cast %27 : vector<8x16x128xf32> to vector<128x128xf32>
    %31 = arith.truncf %30 : vector<128x128xf32> to vector<128x128xbf16>
    %32 = vector.shape_cast %24 : vector<8x16x128xf32> to vector<128x128xf32>
    %33 = arith.truncf %32 : vector<128x128xf32> to vector<128x128xbf16>
    %34 = vector.shape_cast %29 : vector<8x16x128xf32> to vector<128x128xf32>
    %35 = arith.truncf %34 : vector<128x128xf32> to vector<128x128xbf16>
    %36 = vector.extract_strided_slice %31 {offsets = [0, 0], sizes = [96, 128], strides = [1, 1]} : vector<128x128xbf16> to vector<96x128xbf16>
    %c0_19 = arith.constant 0 : index
    %c0_20 = arith.constant 0 : index
    %c0_21 = arith.constant 0 : index
    %37 = vector.load %arg4[%c0_19, %c0_20, %c0_21] : memref<9x128x128xbf16, #tpu.memory_space<vmem>>, vector<1x128x128xbf16>
    %38 = vector.shape_cast %37 : vector<1x128x128xbf16> to vector<128x128xbf16>
    %cst_22 = arith.constant dense<0.000000e+00> : vector<96x128xf32>
    %39 = tpu.matmul %36, %38, %cst_22 {dimension_numbers = #tpu.dot_dimension_numbers<[1], [0], [0], [1], [0, 0, 1, 1], [], []>} : vector<96x128xbf16>, vector<128x128xbf16>, vector<96x128xf32> -> vector<96x128xf32>
    %40 = vector.extract_strided_slice %33 {offsets = [0, 0], sizes = [96, 128], strides = [1, 1]} : vector<128x128xbf16> to vector<96x128xbf16>
    %c1 = arith.constant 1 : index
    %c0_23 = arith.constant 0 : index
    %c0_24 = arith.constant 0 : index
    %41 = vector.load %arg4[%c1, %c0_23, %c0_24] : memref<9x128x128xbf16, #tpu.memory_space<vmem>>, vector<1x128x128xbf16>
    %42 = vector.shape_cast %41 : vector<1x128x128xbf16> to vector<128x128xbf16>
    %cst_25 = arith.constant dense<0.000000e+00> : vector<96x128xf32>
    %43 = tpu.matmul %40, %42, %cst_25 {dimension_numbers = #tpu.dot_dimension_numbers<[1], [0], [0], [1], [0, 0, 1, 1], [], []>} : vector<96x128xbf16>, vector<128x128xbf16>, vector<96x128xf32> -> vector<96x128xf32>
    %44 = arith.addf %39, %43 : vector<96x128xf32>
    %45 = vector.extract_strided_slice %35 {offsets = [0, 0], sizes = [96, 128], strides = [1, 1]} : vector<128x128xbf16> to vector<96x128xbf16>
    %c2_26 = arith.constant 2 : index
    %c0_27 = arith.constant 0 : index
    %c0_28 = arith.constant 0 : index
    %46 = vector.load %arg4[%c2_26, %c0_27, %c0_28] : memref<9x128x128xbf16, #tpu.memory_space<vmem>>, vector<1x128x128xbf16>
    %47 = vector.shape_cast %46 : vector<1x128x128xbf16> to vector<128x128xbf16>
    %cst_29 = arith.constant dense<0.000000e+00> : vector<96x128xf32>
    %48 = tpu.matmul %45, %47, %cst_29 {dimension_numbers = #tpu.dot_dimension_numbers<[1], [0], [0], [1], [0, 0, 1, 1], [], []>} : vector<96x128xbf16>, vector<128x128xbf16>, vector<96x128xf32> -> vector<96x128xf32>
    %49 = arith.addf %44, %48 : vector<96x128xf32>
    %50 = vector.extract_strided_slice %31 {offsets = [16, 0], sizes = [96, 128], strides = [1, 1]} : vector<128x128xbf16> to vector<96x128xbf16>
    %c3 = arith.constant 3 : index
    %c0_30 = arith.constant 0 : index
    %c0_31 = arith.constant 0 : index
    %51 = vector.load %arg4[%c3, %c0_30, %c0_31] : memref<9x128x128xbf16, #tpu.memory_space<vmem>>, vector<1x128x128xbf16>
    %52 = vector.shape_cast %51 : vector<1x128x128xbf16> to vector<128x128xbf16>
    %cst_32 = arith.constant dense<0.000000e+00> : vector<96x128xf32>
    %53 = tpu.matmul %50, %52, %cst_32 {dimension_numbers = #tpu.dot_dimension_numbers<[1], [0], [0], [1], [0, 0, 1, 1], [], []>} : vector<96x128xbf16>, vector<128x128xbf16>, vector<96x128xf32> -> vector<96x128xf32>
    %54 = arith.addf %49, %53 : vector<96x128xf32>
    %55 = vector.extract_strided_slice %33 {offsets = [16, 0], sizes = [96, 128], strides = [1, 1]} : vector<128x128xbf16> to vector<96x128xbf16>
    %c4 = arith.constant 4 : index
    %c0_33 = arith.constant 0 : index
    %c0_34 = arith.constant 0 : index
    %56 = vector.load %arg4[%c4, %c0_33, %c0_34] : memref<9x128x128xbf16, #tpu.memory_space<vmem>>, vector<1x128x128xbf16>
    %57 = vector.shape_cast %56 : vector<1x128x128xbf16> to vector<128x128xbf16>
    %cst_35 = arith.constant dense<0.000000e+00> : vector<96x128xf32>
    %58 = tpu.matmul %55, %57, %cst_35 {dimension_numbers = #tpu.dot_dimension_numbers<[1], [0], [0], [1], [0, 0, 1, 1], [], []>} : vector<96x128xbf16>, vector<128x128xbf16>, vector<96x128xf32> -> vector<96x128xf32>
    %59 = arith.addf %54, %58 : vector<96x128xf32>
    %60 = vector.extract_strided_slice %35 {offsets = [16, 0], sizes = [96, 128], strides = [1, 1]} : vector<128x128xbf16> to vector<96x128xbf16>
    %c5 = arith.constant 5 : index
    %c0_36 = arith.constant 0 : index
    %c0_37 = arith.constant 0 : index
    %61 = vector.load %arg4[%c5, %c0_36, %c0_37] : memref<9x128x128xbf16, #tpu.memory_space<vmem>>, vector<1x128x128xbf16>
    %62 = vector.shape_cast %61 : vector<1x128x128xbf16> to vector<128x128xbf16>
    %cst_38 = arith.constant dense<0.000000e+00> : vector<96x128xf32>
    %63 = tpu.matmul %60, %62, %cst_38 {dimension_numbers = #tpu.dot_dimension_numbers<[1], [0], [0], [1], [0, 0, 1, 1], [], []>} : vector<96x128xbf16>, vector<128x128xbf16>, vector<96x128xf32> -> vector<96x128xf32>
    %64 = arith.addf %59, %63 : vector<96x128xf32>
    %65 = vector.extract_strided_slice %31 {offsets = [32, 0], sizes = [96, 128], strides = [1, 1]} : vector<128x128xbf16> to vector<96x128xbf16>
    %c6 = arith.constant 6 : index
    %c0_39 = arith.constant 0 : index
    %c0_40 = arith.constant 0 : index
    %66 = vector.load %arg4[%c6, %c0_39, %c0_40] : memref<9x128x128xbf16, #tpu.memory_space<vmem>>, vector<1x128x128xbf16>
    %67 = vector.shape_cast %66 : vector<1x128x128xbf16> to vector<128x128xbf16>
    %cst_41 = arith.constant dense<0.000000e+00> : vector<96x128xf32>
    %68 = tpu.matmul %65, %67, %cst_41 {dimension_numbers = #tpu.dot_dimension_numbers<[1], [0], [0], [1], [0, 0, 1, 1], [], []>} : vector<96x128xbf16>, vector<128x128xbf16>, vector<96x128xf32> -> vector<96x128xf32>
    %69 = arith.addf %64, %68 : vector<96x128xf32>
    %70 = vector.extract_strided_slice %33 {offsets = [32, 0], sizes = [96, 128], strides = [1, 1]} : vector<128x128xbf16> to vector<96x128xbf16>
    %c7 = arith.constant 7 : index
    %c0_42 = arith.constant 0 : index
    %c0_43 = arith.constant 0 : index
    %71 = vector.load %arg4[%c7, %c0_42, %c0_43] : memref<9x128x128xbf16, #tpu.memory_space<vmem>>, vector<1x128x128xbf16>
    %72 = vector.shape_cast %71 : vector<1x128x128xbf16> to vector<128x128xbf16>
    %cst_44 = arith.constant dense<0.000000e+00> : vector<96x128xf32>
    %73 = tpu.matmul %70, %72, %cst_44 {dimension_numbers = #tpu.dot_dimension_numbers<[1], [0], [0], [1], [0, 0, 1, 1], [], []>} : vector<96x128xbf16>, vector<128x128xbf16>, vector<96x128xf32> -> vector<96x128xf32>
    %74 = arith.addf %69, %73 : vector<96x128xf32>
    %75 = vector.extract_strided_slice %35 {offsets = [32, 0], sizes = [96, 128], strides = [1, 1]} : vector<128x128xbf16> to vector<96x128xbf16>
    %c8 = arith.constant 8 : index
    %c0_45 = arith.constant 0 : index
    %c0_46 = arith.constant 0 : index
    %76 = vector.load %arg4[%c8, %c0_45, %c0_46] : memref<9x128x128xbf16, #tpu.memory_space<vmem>>, vector<1x128x128xbf16>
    %77 = vector.shape_cast %76 : vector<1x128x128xbf16> to vector<128x128xbf16>
    %cst_47 = arith.constant dense<0.000000e+00> : vector<96x128xf32>
    %78 = tpu.matmul %75, %77, %cst_47 {dimension_numbers = #tpu.dot_dimension_numbers<[1], [0], [0], [1], [0, 0, 1, 1], [], []>} : vector<96x128xbf16>, vector<128x128xbf16>, vector<96x128xf32> -> vector<96x128xf32>
    %79 = arith.addf %74, %78 : vector<96x128xf32>
    %c0_48 = arith.constant 0 : index
    %c0_49 = arith.constant 0 : index
    %80 = vector.load %arg5[%c0_48, %c0_49] : memref<1x128xf32, #tpu.memory_space<vmem>>, vector<1x128xf32>
    %81 = vector.broadcast %80 : vector<1x128xf32> to vector<96x128xf32>
    %82 = arith.addf %79, %81 : vector<96x128xf32>
    %83 = tpu.iota {dimensions = array<i32: 0>} : vector<96x1xi32>
    %c0_i32_50 = arith.constant 0 : i32
    %84 = arith.cmpi sgt, %arg1, %c0_i32_50 : i32
    %c16_i32 = arith.constant 16 : i32
    %85 = vector.broadcast %c16_i32 : i32 to vector<96x1xi32>
    %86 = arith.cmpi sge, %83, %85 : vector<96x1xi32>
    %87 = vector.broadcast %84 : i1 to vector<96x1xi1>
    %88 = arith.ori %87, %86 : vector<96x1xi1>
    %c3_i32_51 = arith.constant 3 : i32
    %89 = arith.cmpi slt, %arg1, %c3_i32_51 : i32
    %c80_i32 = arith.constant 80 : i32
    %90 = vector.broadcast %c80_i32 : i32 to vector<96x1xi32>
    %91 = arith.cmpi slt, %83, %90 : vector<96x1xi32>
    %92 = vector.broadcast %89 : i1 to vector<96x1xi1>
    %93 = arith.ori %92, %91 : vector<96x1xi1>
    %94 = arith.andi %88, %93 : vector<96x1xi1>
    %cst_52 = arith.constant 0.000000e+00 : f32
    %95 = vector.broadcast %cst_52 : f32 to vector<96x128xf32>
    %96 = arith.maximumf %82, %95 : vector<96x128xf32>
    %97 = arith.extui %94 : vector<96x1xi1> to vector<96x1xi32>
    %98 = arith.sitofp %97 : vector<96x1xi32> to vector<96x1xf32>
    %99 = vector.broadcast %98 : vector<96x1xf32> to vector<96x128xf32>
    %100 = arith.mulf %96, %99 : vector<96x128xf32>
    %101 = vector.shape_cast %100 : vector<96x128xf32> to vector<6x16x128xf32>
    %cst_53 = arith.constant 0.000000e+00 : f32
    %102 = vector.broadcast %cst_53 : f32 to vector<6x1x128xf32>
    %103 = vector.extract_strided_slice %101 {offsets = [0, 0, 0], sizes = [6, 15, 128], strides = [1, 1, 1]} : vector<6x16x128xf32> to vector<6x15x128xf32>
    %104 = tpu.concatenate %102, %103 in 1 : vector<6x1x128xf32>, vector<6x15x128xf32> -> vector<6x16x128xf32>
    %105 = vector.extract_strided_slice %101 {offsets = [0, 1, 0], sizes = [6, 15, 128], strides = [1, 1, 1]} : vector<6x16x128xf32> to vector<6x15x128xf32>
    %106 = tpu.concatenate %105, %102 in 1 : vector<6x15x128xf32>, vector<6x1x128xf32> -> vector<6x16x128xf32>
    %107 = vector.shape_cast %104 : vector<6x16x128xf32> to vector<96x128xf32>
    %108 = arith.truncf %107 : vector<96x128xf32> to vector<96x128xbf16>
    %109 = vector.shape_cast %101 : vector<6x16x128xf32> to vector<96x128xf32>
    %110 = arith.truncf %109 : vector<96x128xf32> to vector<96x128xbf16>
    %111 = vector.shape_cast %106 : vector<6x16x128xf32> to vector<96x128xf32>
    %112 = arith.truncf %111 : vector<96x128xf32> to vector<96x128xbf16>
    %113 = vector.extract_strided_slice %108 {offsets = [0, 0], sizes = [64, 128], strides = [1, 1]} : vector<96x128xbf16> to vector<64x128xbf16>
    %c0_54 = arith.constant 0 : index
    %c0_55 = arith.constant 0 : index
    %c0_56 = arith.constant 0 : index
    %114 = vector.load %arg6[%c0_54, %c0_55, %c0_56] : memref<9x128x128xbf16, #tpu.memory_space<vmem>>, vector<1x128x128xbf16>
    %115 = vector.shape_cast %114 : vector<1x128x128xbf16> to vector<128x128xbf16>
    %cst_57 = arith.constant dense<0.000000e+00> : vector<64x128xf32>
    %116 = tpu.matmul %113, %115, %cst_57 {dimension_numbers = #tpu.dot_dimension_numbers<[1], [0], [0], [1], [0, 0, 1, 1], [], []>} : vector<64x128xbf16>, vector<128x128xbf16>, vector<64x128xf32> -> vector<64x128xf32>
    %117 = vector.extract_strided_slice %110 {offsets = [0, 0], sizes = [64, 128], strides = [1, 1]} : vector<96x128xbf16> to vector<64x128xbf16>
    %c1_58 = arith.constant 1 : index
    %c0_59 = arith.constant 0 : index
    %c0_60 = arith.constant 0 : index
    %118 = vector.load %arg6[%c1_58, %c0_59, %c0_60] : memref<9x128x128xbf16, #tpu.memory_space<vmem>>, vector<1x128x128xbf16>
    %119 = vector.shape_cast %118 : vector<1x128x128xbf16> to vector<128x128xbf16>
    %cst_61 = arith.constant dense<0.000000e+00> : vector<64x128xf32>
    %120 = tpu.matmul %117, %119, %cst_61 {dimension_numbers = #tpu.dot_dimension_numbers<[1], [0], [0], [1], [0, 0, 1, 1], [], []>} : vector<64x128xbf16>, vector<128x128xbf16>, vector<64x128xf32> -> vector<64x128xf32>
    %121 = arith.addf %116, %120 : vector<64x128xf32>
    %122 = vector.extract_strided_slice %112 {offsets = [0, 0], sizes = [64, 128], strides = [1, 1]} : vector<96x128xbf16> to vector<64x128xbf16>
    %c2_62 = arith.constant 2 : index
    %c0_63 = arith.constant 0 : index
    %c0_64 = arith.constant 0 : index
    %123 = vector.load %arg6[%c2_62, %c0_63, %c0_64] : memref<9x128x128xbf16, #tpu.memory_space<vmem>>, vector<1x128x128xbf16>
    %124 = vector.shape_cast %123 : vector<1x128x128xbf16> to vector<128x128xbf16>
    %cst_65 = arith.constant dense<0.000000e+00> : vector<64x128xf32>
    %125 = tpu.matmul %122, %124, %cst_65 {dimension_numbers = #tpu.dot_dimension_numbers<[1], [0], [0], [1], [0, 0, 1, 1], [], []>} : vector<64x128xbf16>, vector<128x128xbf16>, vector<64x128xf32> -> vector<64x128xf32>
    %126 = arith.addf %121, %125 : vector<64x128xf32>
    %127 = vector.extract_strided_slice %108 {offsets = [16, 0], sizes = [64, 128], strides = [1, 1]} : vector<96x128xbf16> to vector<64x128xbf16>
    %c3_66 = arith.constant 3 : index
    %c0_67 = arith.constant 0 : index
    %c0_68 = arith.constant 0 : index
    %128 = vector.load %arg6[%c3_66, %c0_67, %c0_68] : memref<9x128x128xbf16, #tpu.memory_space<vmem>>, vector<1x128x128xbf16>
    %129 = vector.shape_cast %128 : vector<1x128x128xbf16> to vector<128x128xbf16>
    %cst_69 = arith.constant dense<0.000000e+00> : vector<64x128xf32>
    %130 = tpu.matmul %127, %129, %cst_69 {dimension_numbers = #tpu.dot_dimension_numbers<[1], [0], [0], [1], [0, 0, 1, 1], [], []>} : vector<64x128xbf16>, vector<128x128xbf16>, vector<64x128xf32> -> vector<64x128xf32>
    %131 = arith.addf %126, %130 : vector<64x128xf32>
    %132 = vector.extract_strided_slice %110 {offsets = [16, 0], sizes = [64, 128], strides = [1, 1]} : vector<96x128xbf16> to vector<64x128xbf16>
    %c4_70 = arith.constant 4 : index
    %c0_71 = arith.constant 0 : index
    %c0_72 = arith.constant 0 : index
    %133 = vector.load %arg6[%c4_70, %c0_71, %c0_72] : memref<9x128x128xbf16, #tpu.memory_space<vmem>>, vector<1x128x128xbf16>
    %134 = vector.shape_cast %133 : vector<1x128x128xbf16> to vector<128x128xbf16>
    %cst_73 = arith.constant dense<0.000000e+00> : vector<64x128xf32>
    %135 = tpu.matmul %132, %134, %cst_73 {dimension_numbers = #tpu.dot_dimension_numbers<[1], [0], [0], [1], [0, 0, 1, 1], [], []>} : vector<64x128xbf16>, vector<128x128xbf16>, vector<64x128xf32> -> vector<64x128xf32>
    %136 = arith.addf %131, %135 : vector<64x128xf32>
    %137 = vector.extract_strided_slice %112 {offsets = [16, 0], sizes = [64, 128], strides = [1, 1]} : vector<96x128xbf16> to vector<64x128xbf16>
    %c5_74 = arith.constant 5 : index
    %c0_75 = arith.constant 0 : index
    %c0_76 = arith.constant 0 : index
    %138 = vector.load %arg6[%c5_74, %c0_75, %c0_76] : memref<9x128x128xbf16, #tpu.memory_space<vmem>>, vector<1x128x128xbf16>
    %139 = vector.shape_cast %138 : vector<1x128x128xbf16> to vector<128x128xbf16>
    %cst_77 = arith.constant dense<0.000000e+00> : vector<64x128xf32>
    %140 = tpu.matmul %137, %139, %cst_77 {dimension_numbers = #tpu.dot_dimension_numbers<[1], [0], [0], [1], [0, 0, 1, 1], [], []>} : vector<64x128xbf16>, vector<128x128xbf16>, vector<64x128xf32> -> vector<64x128xf32>
    %141 = arith.addf %136, %140 : vector<64x128xf32>
    %142 = vector.extract_strided_slice %108 {offsets = [32, 0], sizes = [64, 128], strides = [1, 1]} : vector<96x128xbf16> to vector<64x128xbf16>
    %c6_78 = arith.constant 6 : index
    %c0_79 = arith.constant 0 : index
    %c0_80 = arith.constant 0 : index
    %143 = vector.load %arg6[%c6_78, %c0_79, %c0_80] : memref<9x128x128xbf16, #tpu.memory_space<vmem>>, vector<1x128x128xbf16>
    %144 = vector.shape_cast %143 : vector<1x128x128xbf16> to vector<128x128xbf16>
    %cst_81 = arith.constant dense<0.000000e+00> : vector<64x128xf32>
    %145 = tpu.matmul %142, %144, %cst_81 {dimension_numbers = #tpu.dot_dimension_numbers<[1], [0], [0], [1], [0, 0, 1, 1], [], []>} : vector<64x128xbf16>, vector<128x128xbf16>, vector<64x128xf32> -> vector<64x128xf32>
    %146 = arith.addf %141, %145 : vector<64x128xf32>
    %147 = vector.extract_strided_slice %110 {offsets = [32, 0], sizes = [64, 128], strides = [1, 1]} : vector<96x128xbf16> to vector<64x128xbf16>
    %c7_82 = arith.constant 7 : index
    %c0_83 = arith.constant 0 : index
    %c0_84 = arith.constant 0 : index
    %148 = vector.load %arg6[%c7_82, %c0_83, %c0_84] : memref<9x128x128xbf16, #tpu.memory_space<vmem>>, vector<1x128x128xbf16>
    %149 = vector.shape_cast %148 : vector<1x128x128xbf16> to vector<128x128xbf16>
    %cst_85 = arith.constant dense<0.000000e+00> : vector<64x128xf32>
    %150 = tpu.matmul %147, %149, %cst_85 {dimension_numbers = #tpu.dot_dimension_numbers<[1], [0], [0], [1], [0, 0, 1, 1], [], []>} : vector<64x128xbf16>, vector<128x128xbf16>, vector<64x128xf32> -> vector<64x128xf32>
    %151 = arith.addf %146, %150 : vector<64x128xf32>
    %152 = vector.extract_strided_slice %112 {offsets = [32, 0], sizes = [64, 128], strides = [1, 1]} : vector<96x128xbf16> to vector<64x128xbf16>
    %c8_86 = arith.constant 8 : index
    %c0_87 = arith.constant 0 : index
    %c0_88 = arith.constant 0 : index
    %153 = vector.load %arg6[%c8_86, %c0_87, %c0_88] : memref<9x128x128xbf16, #tpu.memory_space<vmem>>, vector<1x128x128xbf16>
    %154 = vector.shape_cast %153 : vector<1x128x128xbf16> to vector<128x128xbf16>
    %cst_89 = arith.constant dense<0.000000e+00> : vector<64x128xf32>
    %155 = tpu.matmul %152, %154, %cst_89 {dimension_numbers = #tpu.dot_dimension_numbers<[1], [0], [0], [1], [0, 0, 1, 1], [], []>} : vector<64x128xbf16>, vector<128x128xbf16>, vector<64x128xf32> -> vector<64x128xf32>
    %156 = arith.addf %151, %155 : vector<64x128xf32>
    %c0_90 = arith.constant 0 : index
    %c0_91 = arith.constant 0 : index
    %157 = vector.load %arg7[%c0_90, %c0_91] : memref<1x128xf32, #tpu.memory_space<vmem>>, vector<1x128xf32>
    %158 = vector.broadcast %157 : vector<1x128xf32> to vector<64x128xf32>
    %159 = arith.addf %156, %158 : vector<64x128xf32>
    %160 = vector.shape_cast %159 : vector<64x128xf32> to vector<4x16x128xf32>
    %c0_92 = arith.constant 0 : index
    %c0_93 = arith.constant 0 : index
    %c0_94 = arith.constant 0 : index
    %c0_95 = arith.constant 0 : index
    %161 = vector.load %arg3[%c0_92, %c0_93, %c0_94, %c0_95] : memref<1x4x16x128xf32, #tpu.memory_space<vmem>>, vector<1x4x16x128xf32>
    %162 = vector.shape_cast %161 : vector<1x4x16x128xf32> to vector<4x16x128xf32>
    %163 = arith.addf %160, %162 : vector<4x16x128xf32>
    %c0_96 = arith.constant 0 : index
    %c0_97 = arith.constant 0 : index
    %c0_98 = arith.constant 0 : index
    %c0_99 = arith.constant 0 : index
    %164 = vector.load %arg8[%c0_96, %c0_97, %c0_98, %c0_99] : memref<1x4x16x128xf32, #tpu.memory_space<vmem>>, vector<1x4x16x128xf32>
    %165 = vector.shape_cast %164 : vector<1x4x16x128xf32> to vector<4x16x128xf32>
    %166 = vector.shape_cast %163 : vector<4x16x128xf32> to vector<1x4x16x128xf32>
    tpu.vector_store %arg8[%c0_96, %c0_97, %c0_98, %c0_99], %166 {strides = array<i32>} : memref<1x4x16x128xf32, #tpu.memory_space<vmem>>, vector<1x4x16x128xf32>,
    return
  }
  func.func @transform_1(%arg0: i32, %arg1: i32) -> (i32, i32, i32, i32) {
    %c0_i32 = arith.constant 0 : i32
    %c0_i32_0 = arith.constant 0 : i32
    %c0_i32_1 = arith.constant 0 : i32
    return %arg0, %arg1, %c0_i32, %c0_i32_0 : i32, i32, i32, i32
  }
  func.func @transform_2(%arg0: i32, %arg1: i32) -> (i32, i32, i32) {
    %c0_i32 = arith.constant 0 : i32
    %c0_i32_0 = arith.constant 0 : i32
    %c0_i32_1 = arith.constant 0 : i32
    %c0_i32_2 = arith.constant 0 : i32
    return %c0_i32, %c0_i32_0, %c0_i32_1 : i32, i32, i32
  }
  func.func @transform_3(%arg0: i32, %arg1: i32) -> (i32, i32) {
    %c0_i32 = arith.constant 0 : i32
    %c0_i32_0 = arith.constant 0 : i32
    %c0_i32_1 = arith.constant 0 : i32
    return %c0_i32, %c0_i32_0 : i32, i32
  }
  func.func @transform_4(%arg0: i32, %arg1: i32) -> (i32, i32, i32) {
    %c0_i32 = arith.constant 0 : i32
    %c0_i32_0 = arith.constant 0 : i32
    %c0_i32_1 = arith.constant 0 : i32
    %c0_i32_2 = arith.constant 0 : i32
    return %c0_i32, %c0_i32_0, %c0_i32_1 : i32, i32, i32
  }
  func.func @transform_5(%arg0: i32, %arg1: i32) -> (i32, i32) {
    %c0_i32 = arith.constant 0 : i32
    %c0_i32_0 = arith.constant 0 : i32
    %c0_i32_1 = arith.constant 0 : i32
    return %c0_i32, %c0_i32_0 : i32, i32
  }
  func.func @transform_6(%arg0: i32, %arg1: i32) -> (i32, i32, i32, i32) {
    %c0_i32 = arith.constant 0 : i32
    %c0_i32_0 = arith.constant 0 : i32
    %c0_i32_1 = arith.constant 0 : i32
    return %arg0, %arg1, %c0_i32, %c0_i32_0 : i32, i32, i32, i32
  }
}

</mosaic_0001>

<bundles_post_ra>
// kernel: tpu_custom_call.1
= control target key start
LH: loop header
LB: loop body
LE: loop exit
PB: predicated region body
PF: predicated region fallthrough
CT: control target
= control target key end

     0   :  { %s5194_s0 = inlined_call_operand.hbm [shape: f32[2,16,16,128], index: 0, kind: input, shape index: {}]   ;;  %s5195_s1 = inlined_call_operand.hbm [shape: f32[2,16,16,128], index: 1, kind: input, shape index: {}]   ;;  %s5196_s2 = inlined_call_operand.hbm [shape: bf16[9,128,128], index: 2, kind: input, shape index: {}]   ;;  %s5197_s3 = inlined_call_operand.vmem [shape: f32[1,128], index: 3, kind: input, shape index: {}]   ;;  %s5198_s4 = inlined_call_operand.hbm [shape: bf16[9,128,128], index: 4, kind: input, shape index: {}]   ;;  %s5199_s5 = inlined_call_operand.vmem [shape: f32[1,128], index: 5, kind: input, shape index: {}]   ;;  %s5200_s6 = inlined_call_operand.hbm [shape: f32[2,16,16,128], index: 6, kind: output, shape index: {}]  }
   0x1   :  { %5207 = sst [smem:[#allocation26_spill]] %s5196_s2 }
   0x2   :  { %5208 = sst [smem:[#allocation27_spill]] %s5197_s3 }
   0x3   :  { %5209 = sst [smem:[#allocation28_spill]] %s5198_s4 }
   0x4   :  { %5210 = sst [smem:[#allocation29_spill]] %s5199_s5 }
   0x5   :  { %5211 = sst [smem:[#allocation30_spill]] %s5200_s6 }
   0x6   :  { %11 = vsyncpa [#allocation5], 0 }
   0x7   :  { %13 = vsyncpa [#allocation5 + $0x1], 0 }
   0x8   :  { %14 = vsyncpa [#allocation8], 0 }
   0x9   :  { %15 = vsyncpa [#allocation6], 0 }
   0xa   :  { %17 = vsyncpa [#allocation6 + $0x1], 0  ;;  %s4430_s21 = smov 0   ;;  %s4432_s22 = smov 0  }
   0xb   :  { %s4434_s23 = smov 0   ;;  %s4436_s24 = smov 0  }
   0xc   :  { %s4438_s25 = smov 0   ;;  %s4440_s26 = smov 0  }
   0xd   :  { %s4442_s27 = smov 0   ;;  %s4444_s28 = smov 0  }
   0xe LB: > { %5212 = sst [smem:[#allocation22_spill]] %s4352_s21  ;;  %s3229_s29 = sadd.s32 4294967295, %s4380_s28   ;;  %s4380_s28 = sphi %s4444_s28, %s23_s28   ;;  %s4376_s27 = sphi %s4442_s27, %s5240_s27   ;;  %s4372_s26 = sphi %s4440_s26, %s5239_s26   ;;  %s4368_s25 = sphi %s4438_s25, %s5238_s25   ;;  %s4364_s24 = sphi %s4436_s24, %s5237_s24   ;;  %s4360_s23 = sphi %s4434_s23, %s5236_s23   ;;  %s4356_s22 = sphi %s4432_s22, %s5235_s22   ;;  %s4352_s21 = sphi %s4430_s21, %s5234_s21  }
   0xf   : > { %s3230_s30 = sadd.s32 4294967294, %s4380_s28   ;;  %p57_p0 = scmp.ne.s32.totalorder %s4356_s22, %s4352_s21 }
  0x10   : > { %p4474_p1 = scmp.eq.s32.totalorder %s3229_s29, 0  ;;  %p4478_p2 = scmp.eq.s32.totalorder %s3229_s29, 7 }
  0x11   : > { %p173_p3 = scmp.eq.s32.totalorder %s3230_s30, 7  ;;  %p3231_p5 = scmp.ge.s32.totalorder %s4380_s28, 1 }
  0x12   : > { %p4484_p4 = por %p4474_p1, %p57_p0  ;;  %p180_p7 = scmp.lt.s32.totalorder %s4380_s28, 9 }
  0x13   : > { %p4489_p6 = por %p173_p3, %p57_p0  ;;  %s5218_s2 = sld [smem:[#allocation26_spill]] }
  0x14   : > { %p4497_p8 = pnand %p3231_p5, %p180_p7  ;;  %s4382_s15 = smov [#allocation7]  }
  0x15   : > { %s5216_s10 = scalar_select %p4489_p6, 1, 0 }
  0x16   : > { %p4026_p9 = pneg %p4497_p8  ;;  %s193_s16 = sshll.u32 %s4382_s15, 4  ;;  %s194_s16 = int_to_ptr.vmem [resolvable:$true] %s193_s16 }
  0x17   : > { %5217 = sst [smem:[#allocation23_spill]] %s5216_s10  ;;  %s4383_s20 = smov 64  }
  0x18   : > { %p4027_p10 = pnand %p4026_p9, %p4474_p1  ;;  %s5220_s4 = sld [smem:[#allocation28_spill]] }
  0x19   : > { %s191_s13 = sshll.u32 %s5218_s2, 4  ;;  %s4384_s29 = smov 4   ;;  %s192_s13 = int_to_ptr.hbm [resolvable:$true] %s191_s13 }
  0x1a   : > { %4029 = dma.hbm_to_vmem [thread:$0]  (!%p4027_p10), %s192_s13, 9216, %s194_s16, [#allocation8], %s4383_s20, %s4383_s20, %s4384_s29  }
  0x1b   : > { %s4385_s30 = smov [#allocation9]   ;;  %s32_s12 = sadd.s32 1, %s4372_s26 }
  0x1c   : > { %s210_s11 = sshll.u32 %s4385_s30, 4  ;;  %s35_s15 = sadd.s32 1, %s4376_s27  ;;  %s211_s11 = int_to_ptr.vmem [resolvable:$true] %s210_s11 }
  0x1d   : > { %p33_p11 = scmp.ge.s32.totalorder %s32_s12, 4  ;;  %s44_s17 = sadd.s32 1, %s4360_s23 }
  0x1e   : > { %s208_s19 = sshll.u32 %s5220_s4, 4  ;;  %p51_p12 = scmp.ne.s32.totalorder %s4360_s23, %s4356_s22  ;;  %s209_s19 = int_to_ptr.hbm [resolvable:$true] %s208_s19 }
  0x1f   : > { %4032 = dma.hbm_to_vmem [thread:$0]  (!%p4027_p10), %s209_s19, 9216, %s211_s11, [#allocation8], %s4383_s20, %s4383_s20, %s4384_s29  }
  0x20   : > { %p52_p13 = scmp.eq.s32.totalorder %s4380_s28, 0  ;;  %s5242_s12 = smov (%p33_p11, %s32_s12), 0 }
  0x21   : > { %5221 = sst [smem:[#allocation24_spill]] %s5242_s12  ;;  %s5244_s15 = smov (!%p33_p11, %s35_s15), %s4376_s27 }
  0x22   : > { %s40_s13 = ssub.s32 %s4372_s26, %s5242_s12  ;;  %p4519_p0 = por %p52_p13, %p51_p12 }
  0x23   : > { %p37_p3 = scmp.ge.s32.totalorder %s5244_s15, 2  ;;  %p4525_p5 = por %p4478_p2, %p51_p12 }
  0x24   : > { %p4043_p7 = scmp.lt.s32.totalorder %s4380_s28, 8  ;;  %s227_s19 = sand.u32 1, %s4360_s23  }
  0x25   : > { %s5223_s18 = scalar_select %p4525_p5, 1, 0 }
  0x26   : > { %s5246_s15 = smov (%p37_p3, %s5244_s15), 0  ;;  %s3235_s20 = sshll.u32 %s227_s19, 6 }
  0x27   : > { %5224 = sst [smem:[#allocation25_spill]] %s5223_s18  ;;  %s39_s29 = ssub.s32 %s4376_s27, %s5246_s15 }
  0x28   : > { %s41_s30 = sor.u32 %s40_s13, %s39_s29  ;;  %s3847_s11 = sshll.u32 %s4372_s26, 3 }
  0x29   : > { %p42_p9 = scmp.eq.s32.totalorder %s41_s30, 0  ;;  %s3238_s2 = sshll.u32 %s4376_s27, 5 }
  0x2a   : > { %s237_s4 = sadd.s32 %s3847_s11, %s3238_s2  ;;  %s231_s12 = scalar_lea.vmem [#allocation4], %s3235_s20 }
  0x2b   : > { %s242_s8 = sshll.u32 %s231_s12, 4  ;;  %s3239_s21 = sshll.u32 %s237_s4, 3  ;;  %s243_s8 = int_to_ptr.vmem [resolvable:$true] %s242_s8 }
  0x2c   : > { %s4538_s10 = scalar_select %p42_p9, %s4360_s23, %s44_s17  }
  0x2d   : > { %s239_s5 = scalar_lea.hbm %s5195_s1, %s3239_s21  ;;  %p4034_p2 = pnand %p4043_p7, %p4519_p0 }
  0x2e   : > { %s240_s3 = sshll.u32 %s239_s5, 4  ;;  %s228_s13 = scalar_lea.sflag [#allocation5], %s227_s19  ;;  %s241_s3 = int_to_ptr.hbm [resolvable:$true] %s240_s3 }
  0x2f   : > { %s4386_s29 = smov 128   ;;  %s4387_s30 = smov 8  }
  0x30   : > { %4036 = dma.hbm_to_vmem [thread:$0]  (!%p4034_p2), %s241_s3, 1024, %s243_s8, %s228_s13, %s4386_s29, %s4386_s29, %s4387_s30  }
  0x31   : > { %254 = sbr.rel (%p4497_p8) target bundleno = 845 (0x34d), region = 40  ;;  %s4550_s2 = sand.u32 (!%p4497_p8), 1, %s4356_s22  }
  0x32   : > { %s3241_s4 = sshll.u32 (!%p4497_p8), %s4550_s2, 6  ;;  %s257_s6 = scalar_lea.sflag (!%p4497_p8), [#allocation5], %s4550_s2 }
  0x33   : > { %s4556_s21 = scalar_lea.vmem (!%p4497_p8), [#allocation4], %s3241_s4 }
  0x36   : > { %4335 = dma.done.wait (%p4484_p4), %s257_s6, 1024  }
  0x37   : > { %4337 = vsyncadd (%p4484_p4), %s257_s6, 4294966272 }
  0x38   : > { %4339 = dma.done.wait (%p4474_p1), [#allocation8], 18432  }
  0x39   : > { %4341 = vsyncadd (%p4474_p1), [#allocation8], 4294948864  ;;  %s3245_s3 = sshll.u32 %s4364_s24, 2  ;;  %p301_p8 = scmp.gt.s32.totalorder %s4364_s24, 0 }
  0x3a   : > { %p3246_p10 = scmp.le.s32.totalorder %s4364_s24, 0  ;;  %s3247_s5 = sadd.s32 4294967294, %s3245_s3 }
  0x3b   : > { %s3249_s14 = sshll.u32 %s4368_s25, 8  ;;  %s3248_s12 = sshll.u32 %s3247_s5, 4 }
  0x3c   : > { %s308_s9 = sadd.s32 %s3249_s14, %s3248_s12  ;;  %s4388_s17 = smov [#allocation2]  }
  0x3d   : > { %s319_s16 = sshll.u32 %s4388_s17, 4  ;;  %s309_s7 = scalar_lea.hbm %s5194_s0, %s308_s9  ;;  %s320_s16 = int_to_ptr.vmem [resolvable:$true] %s319_s16 }
  0x3e   : > { %s317_s20 = sshll.u32 %s309_s7, 4  ;;  %s3848_s11 = sshll.u32 %s4364_s24, 6  ;;  %s318_s20 = int_to_ptr.hbm [resolvable:$true] %s317_s20 }
  0x3f   : > { %s3162_s8 = sadd.s32 %s3848_s11, %s3249_s14  ;;  %s4218_s13 = sshra.s32 %s318_s20, 4  ;;  %s4219_s13 = int_to_ptr.hbm [resolvable:$true] %s4218_s13 }
  0x40   : > { %s4220_s29 = scalar_lea.hbm %s4219_s13, 32  ;;  %s4224_s3 = scalar_lea.hbm %s5194_s0, 512 }
  0x41   : > { %p4221_p1 = scmp.ne.s32.totalorder %s4219_s13, %s4220_s29  ;;  %p4225_p12 = scmp.lt.s32.totalorder %s4219_s13, %s5194_s0 }
  0x42   : > { %p4226_p13 = scmp.lt.s32.totalorder %s4224_s3, %s4220_s29 }
  0x43   : > { %p4222_p4 = pnand %p4221_p1, %p301_p8 }
  0x44   : > { %p4227_p0 = por %p4226_p13, %p4225_p12 }
  0x45   : > { %p4223_p11 = pneg %p4222_p4 }
  0x47   : > { %p4228_p3 = pnand %p4227_p0, %p4223_p11 }
  0x49   : > { %4231 = shalt.err (!%p4228_p3)  }
  0x4a   : > { %4021 = dma.hbm_to_vmem [thread:$0]  (%p301_p8), %s318_s20, 512, %s320_s16, [#allocation3]  ;;  %v347_v0 = vld [vmem:[%s4556_s21] sm:$0xff]  ;;  %v348_v1 = vld [vmem:[%s4556_s21 + $0x8] sm:$0xff]  ;;  %v349_v2 = vld [vmem:[%s4556_s21 + $0x10] sm:$0xff] }
  0x4b   : > { %p323_p7 = scmp.lt.s32.totalorder %s4364_s24, 3  ;;  %p3250_p9 = scmp.ge.s32.totalorder %s4364_s24, 3  ;;  %v355_v3 = vmax.f32 %v347_v0, 0.0  ;;  %v350_v4 = vld [vmem:[%s4556_s21 + $0x18] sm:$0xff]  ;;  %v356_v5 = vmax.f32 %v348_v1, 0.0  ;;  %v351_v6 = vld [vmem:[%s4556_s21 + $0x20] sm:$0xff] }
  0x4c   : > { %s3163_s19 = scalar_lea.hbm %s5194_s0, %s3162_s8  ;;  %s4389_s11 = smov [#allocation2 + $0x60]   ;;  %v357_v7 = vmax.f32 %v349_v2, 0.0  ;;  %v352_v8 = vld [vmem:[%s4556_s21 + $0x28] sm:$0xff] }
  0x4d   : > { %s3164_s7 = scalar_lea.hbm %s3163_s19, 64  ;;  %s343_s13 = sshll.u32 %s4389_s11, 4  ;;  %s344_s13 = int_to_ptr.vmem [resolvable:$true] %s343_s13 }
  0x4e   : > { %s341_s29 = sshll.u32 %s3164_s7, 4  ;;  %s342_s29 = int_to_ptr.hbm [resolvable:$true] %s341_s29 }
  0x4f   : > { %s4246_s16 = sshra.s32 %s342_s29, 4  ;;  %s4247_s16 = int_to_ptr.hbm [resolvable:$true] %s4246_s16 }
  0x50   : > { %s4248_s20 = scalar_lea.hbm %s4247_s16, 32  ;;  %p4253_p11 = scmp.lt.s32.totalorder %s4247_s16, %s5194_s0 }
  0x51   : > { %p4249_p2 = scmp.ne.s32.totalorder %s4247_s16, %s4248_s20  ;;  %p4254_p12 = scmp.lt.s32.totalorder %s4224_s3, %s4248_s20 }
  0x53   : > { %p4250_p1 = pnand %p4249_p2, %p323_p7  ;;  %p4255_p13 = por %p4254_p12, %p4253_p11 }
  0x55   : > { %p4251_p4 = pneg %p4250_p1 }
  0x57   : > { %p4256_p0 = pnand %p4255_p13, %p4251_p4 }
  0x59   : > { %4259 = shalt.err (!%p4256_p0)  }
  0x5a   : > { %4023 = dma.hbm_to_vmem [thread:$0]  (%p323_p7), %s342_s29, 512, %s344_s13, [#allocation3 + $0x1]  ;;  %v358_v9 = vmax.f32 %v350_v4, 0.0  ;;  %v353_v10 = vld [vmem:[%s4556_s21 + $0x30] sm:$0xff]  ;;  %v359_v11 = vmax.f32 %v351_v6, 0.0  ;;  %v354_v12 = vld [vmem:[%s4556_s21 + $0x38] sm:$0xff] }
  0x5b   : > { %364 = vst [vmem:[#allocation2 + $0x20] sm:$0xff] %v355_v3  ;;  %v360_v13 = vmax.f32 %v352_v8, 0.0  ;;  %v361_v14 = vmax.f32 %v353_v10, 0.0  ;;  %v362_v15 = vmax.f32 %v354_v12, 0.0  ;;  %s4614_s3 = scalar_lea.vmem [#allocation10], %s3241_s4  ;;  %p3254_p3 = scmp.ne.s32.totalorder %s4364_s24, 0 }
  0x5c   : > { %365 = vst [vmem:[#allocation2 + $0x28] sm:$0xff] %v356_v5 }
  0x5d   : > { %366 = vst [vmem:[#allocation2 + $0x30] sm:$0xff] %v357_v7 }
  0x5e   : > { %367 = vst [vmem:[#allocation2 + $0x38] sm:$0xff] %v358_v9  ;;  %375 = sbr.rel (%p3254_p3) target bundleno = 104 (0x68), region = 72 }
  0x5f   : > { %368 = vst [vmem:[#allocation2 + $0x40] sm:$0xff] %v359_v11 }
  0x60   : > { %369 = vst [vmem:[#allocation2 + $0x48] sm:$0xff] %v360_v13 }
  0x61   : > { %370 = vst [vmem:[#allocation2 + $0x50] sm:$0xff] %v361_v14 }
  0x62   : > { %371 = vst [vmem:[#allocation2 + $0x58] sm:$0xff] %v362_v15 }
  0x63   : > { %v4390_v16 = vmov 0.0  }
  0x64   : > { %376 = vst [vmem:[#allocation2] sm:$0xff] %v4390_v16 }
  0x65   : > { %377 = vst [vmem:[#allocation2 + $0x8] sm:$0xff] %v4390_v16 }
  0x66   : > { %378 = vst [vmem:[#allocation2 + $0x10] sm:$0xff] %v4390_v16 }
  0x67   : > { %379 = vst [vmem:[#allocation2 + $0x18] sm:$0xff] %v4390_v16 }
  0x68 PF: > { %p3255_p2 = scmp.ne.s32.totalorder %s4364_s24, 3 }
  0x6a   : > { %383 = sbr.rel (%p3255_p2) target bundleno = 116 (0x74), region = 76 }
  0x6f   : > { %v4391_v17 = vmov 0.0  }
  0x70   : > { %385 = vst [vmem:[#allocation2 + $0x60] sm:$0xff] %v4391_v17 }
  0x71   : > { %386 = vst [vmem:[#allocation2 + $0x68] sm:$0xff] %v4391_v17 }
  0x72   : > { %387 = vst [vmem:[#allocation2 + $0x70] sm:$0xff] %v4391_v17 }
  0x73   : > { %388 = vst [vmem:[#allocation2 + $0x78] sm:$0xff] %v4391_v17 }
  0x74 PF: > { %391 = sbr.rel (%p3246_p10) target bundleno = 129 (0x81), region = 80 }
  0x79   : > { %4342 = dma.done.wait [#allocation3], 512 }
  0x7a   : > { %4343 = vsyncadd [#allocation3], 4294966784  ;;  %v396_v18 = vld [vmem:[#allocation2] sm:$0xff]  ;;  %v397_v19 = vld [vmem:[#allocation2 + $0x8] sm:$0xff] }
  0x7b   : > { %v398_v20 = vld [vmem:[#allocation2 + $0x10] sm:$0xff]  ;;  %v400_v21 = vmax.f32 %v396_v18, 0.0  ;;  %v401_v22 = vmax.f32 %v397_v19, 0.0  ;;  %v399_v24 = vld [vmem:[#allocation2 + $0x18] sm:$0xff] }
  0x7c   : > { %v402_v23 = vmax.f32 %v398_v20, 0.0  ;;  %v403_v25 = vmax.f32 %v399_v24, 0.0 }
  0x7d   : > { %404 = vst [vmem:[#allocation2] sm:$0xff] %v400_v21 }
  0x7e   : > { %405 = vst [vmem:[#allocation2 + $0x8] sm:$0xff] %v401_v22 }
  0x7f   : > { %406 = vst [vmem:[#allocation2 + $0x10] sm:$0xff] %v402_v23 }
  0x80   : > { %407 = vst [vmem:[#allocation2 + $0x18] sm:$0xff] %v403_v25 }
  0x81 PF: > { %410 = sbr.rel (%p3250_p9) target bundleno = 142 (0x8e), region = 84 }
  0x86   : > { %4344 = dma.done.wait [#allocation3 + $0x1], 512 }
  0x87   : > { %4345 = vsyncadd [#allocation3 + $0x1], 4294966784  ;;  %v417_v26 = vld [vmem:[#allocation2 + $0x60] sm:$0xff]  ;;  %v418_v27 = vld [vmem:[#allocation2 + $0x68] sm:$0xff] }
  0x88   : > { %v419_v28 = vld [vmem:[#allocation2 + $0x70] sm:$0xff]  ;;  %v421_v29 = vmax.f32 %v417_v26, 0.0  ;;  %v422_v30 = vmax.f32 %v418_v27, 0.0  ;;  %v420_v32 = vld [vmem:[#allocation2 + $0x78] sm:$0xff] }
  0x89   : > { %v423_v31 = vmax.f32 %v419_v28, 0.0  ;;  %v424_v33 = vmax.f32 %v420_v32, 0.0 }
  0x8a   : > { %425 = vst [vmem:[#allocation2 + $0x60] sm:$0xff] %v421_v29 }
  0x8b   : > { %426 = vst [vmem:[#allocation2 + $0x68] sm:$0xff] %v422_v30 }
  0x8c   : > { %427 = vst [vmem:[#allocation2 + $0x70] sm:$0xff] %v423_v31 }
  0x8d   : > { %428 = vst [vmem:[#allocation2 + $0x78] sm:$0xff] %v424_v33 }
  0x8e PF: > { %vm461_vm0 = vcmask 1040384   ;;  %vm510_vm1 = vcmask 1046528   ;;  %s1811_s4 = scalar_select %p301_p8, 1, 0 }
  0x8f   : > { %v3864_v34 = vld [vmem:[#allocation7 + $0x78] sm:$0xff]  ;;  %v3863_v38 = vld [vmem:[#allocation7 + $0x70] sm:$0xff]  ;;  %v3862_v42 = vld [vmem:[#allocation7 + $0x68] sm:$0xff]  ;;  %s5225_s17 = sld [smem:[#allocation27_spill]]  ;;  %s3993_s11 = sshll.u32 %s4364_s24, 3 }
  0x90   : > { %v3856_v35 = vld [vmem:[#allocation7 + $0x38] sm:$0xff]  ;;  %724 = vmatpush.bf16.msra.mxu0 %v3864_v34  ;;  %v3855_v39 = vld [vmem:[#allocation7 + $0x30] sm:$0xff]  ;;  %v3854_v43 = vld [vmem:[#allocation7 + $0x28] sm:$0xff]  ;;  %s1838_s14 = scalar_select %p323_p7, 1, 0 }
  0x91   : > { %v3872_v36 = vld [vmem:[#allocation7 + $0xb8] sm:$0xff]  ;;  %847 = vmatpush.bf16.msra.mxu1 %v3856_v35  ;;  %v3871_v40 = vld [vmem:[#allocation7 + $0xb0] sm:$0xff]  ;;  %v3870_v44 = vld [vmem:[#allocation7 + $0xa8] sm:$0xff]  ;;  %s5228_s7 = sld [smem:[#allocation29_spill]]  ;;  %s3841_s13 = sshll.u32 %s4368_s25, 5 }
  0x92   : > { %v3880_v37 = vld [vmem:[#allocation7 + $0xf8] sm:$0xff]  ;;  %987 = vmatpush.bf16.msra.mxu2 %v3872_v36  ;;  %v3879_v41 = vld [vmem:[#allocation7 + $0xf0] sm:$0xff]  ;;  %v3878_v45 = vld [vmem:[#allocation7 + $0xe8] sm:$0xff]  ;;  %s3091_s29 = sadd.s32 %s3993_s11, %s3841_s13  ;;  %s5229_s20 = sld [smem:[#allocation30_spill]] }
  0x93   : > { %1109 = vmatpush.bf16.msra.mxu3 %v3880_v37  ;;  %v3861_v46 = vld [vmem:[#allocation7 + $0x60] sm:$0xff]  ;;  %v430_v51 = vld [vmem:[#allocation2 + $0x8] sm:$0xff]  ;;  %v4622_v52 = vld [vmem:[#allocation2 + $0x10] sm:$0xff]  ;;  %s3842_s16 = sshll.u32 %s3091_s29, 3  ;;  %s3094_s6 = sshll.u32 %s4614_s3, 4  ;;  %s3095_s6 = int_to_ptr.vmem [resolvable:$true] %s3094_s6 }
  0x94   : > { %725 = vmatpush.bf16.msra.mxu0 %v3863_v38  ;;  %v3853_v47 = vld [vmem:[#allocation7 + $0x20] sm:$0xff]  ;;  %v4624_v53 = vld [vmem:[#allocation2 + $0x18] sm:$0xff]  ;;  %v463_v56 = vrot.slane %v430_v51, 7  ;;  %v512_v59 = vrot.slane %v430_v51, 1  ;;  %v465_v62 = vrot.slane %v4622_v52, 7  ;;  %v3859_v0 = vld [vmem:[#allocation7 + $0x50] sm:$0xff]  ;;  %v576_v11 = vpack.c.bf16 %v430_v51, %v430_v51 }
  0x95   : > { %848 = vmatpush.bf16.msra.mxu1 %v3855_v39  ;;  %v3869_v48 = vld [vmem:[#allocation7 + $0xa0] sm:$0xff]  ;;  %v3860_v54 = vld [vmem:[#allocation7 + $0x58] sm:$0xff]  ;;  %v466_v63 = vrot.slane %v4624_v53, 7  ;;  %v3851_v1 = vld [vmem:[#allocation7 + $0x10] sm:$0xff]  ;;  %v577_v51 = vpack.c.bf16 %v4622_v52, %v4622_v52 }
  0x96   : > { %988 = vmatpush.bf16.msra.mxu2 %v3871_v40  ;;  %v3877_v49 = vld [vmem:[#allocation7 + $0xe0] sm:$0xff]  ;;  %v3852_v55 = vld [vmem:[#allocation7 + $0x18] sm:$0xff]  ;;  %v3867_v5 = vld [vmem:[#allocation7 + $0x90] sm:$0xff]  ;;  %v551_v7 = vsel %vm510_vm1, %v512_v59, 0.0  ;;  %v503_v9 = vsel %vm461_vm0, 0.0, %v465_v62  ;;  %v653_v23 = vunpack.c.l.b16 %v576_v11 }
  0x97   : > { %1110 = vmatpush.bf16.msra.mxu3 %v3879_v41  ;;  %v429_v50 = vld [vmem:[#allocation2] sm:$0xff]  ;;  %v3868_v60 = vld [vmem:[#allocation7 + $0x98] sm:$0xff]  ;;  %v3875_v6 = vld [vmem:[#allocation7 + $0xd0] sm:$0xff]  ;;  %v467_v8 = vsel %vm461_vm0, %v465_v62, %v466_v63  ;;  %v592_v17 = vpack.c.bf16 %v551_v7, %v551_v7  ;;  %v561_v18 = vpack.c.bf16 %v503_v9, %v503_v9  ;;  %v514_v41 = vrot.slane %v4622_v52, 1 }
  0x98   : > { %726 = vmatpush.bf16.msra.mxu0 %v3862_v42  ;;  %v511_v57 = vrot.slane %v429_v50, 1  ;;  %v462_v58 = vrot.slane %v429_v50, 7  ;;  %v3876_v61 = vld [vmem:[#allocation7 + $0xd8] sm:$0xff]  ;;  %v575_v10 = vpack.c.bf16 %v429_v50, %v429_v50  ;;  %v3858_v15 = vld [vmem:[#allocation7 + $0x48] sm:$0xff]  ;;  %v562_v19 = vpack.c.bf16 %v467_v8, %v467_v8  ;;  %v3857_v26 = vld [vmem:[#allocation7 + $0x40] sm:$0xff]  ;;  %s3093_s8 = scalar_lea.hbm %s5229_s20, %s3842_s16  ;;  %s4294_s18 = scalar_lea.hbm %s5229_s20, 512 }
  0x99   : > { %849 = vmatpush.bf16.msra.mxu1 %v3854_v43  ;;  %v3850_v16 = vld [vmem:[#allocation7 + $0x8] sm:$0xff]  ;;  %v3849_v27 = vld [vmem:[#allocation7] sm:$0xff]  ;;  %v916_v29 = vunpack.c.l.b16 %v592_v17  ;;  %v777_v30 = vunpack.c.l.b16 %v561_v18  ;;  %v3888_v34 = vld [vmem:[#allocation7 + $0x138] sm:$0xff]  ;;  %v515_v42 = vrot.slane %v4624_v53, 1  ;;  %s3096_s5 = sshll.u32 %s3093_s8, 4  ;;  %s3097_s5 = int_to_ptr.hbm [resolvable:$true] %s3096_s5 }
  0x9a   : > { %989 = vmatpush.bf16.msra.mxu2 %v3870_v44  ;;  %v464_v2 = vsel %vm461_vm0, %v462_v58, %v463_v56  ;;  %v502_v3 = vsel %vm461_vm0, 0.0, %v462_v58  ;;  %v513_v4 = vsel %vm510_vm1, %v511_v57, %v512_v59  ;;  %v3866_v20 = vld [vmem:[#allocation7 + $0x88] sm:$0xff]  ;;  %v652_v22 = vunpack.c.l.b16 %v575_v10  ;;  %v3865_v32 = vld [vmem:[#allocation7 + $0x80] sm:$0xff]  ;;  %v3884_v9 = vld [vmem:[#allocation7 + $0x118] sm:$0xff]  ;;  %s4288_s12 = sshra.s32 %s3097_s5, 4  ;;  %s4289_s12 = int_to_ptr.hbm [resolvable:$true] %s4288_s12 }
  0x9b   : > { %1111 = vmatpush.bf16.msra.mxu3 %v3878_v45  ;;  %v559_v12 = vpack.c.bf16 %v502_v3, %v502_v3  ;;  %v560_v13 = vpack.c.bf16 %v464_v2, %v464_v2  ;;  %v591_v14 = vpack.c.bf16 %v513_v4, %v513_v4  ;;  %v3874_v21 = vld [vmem:[#allocation7 + $0xc8] sm:$0xff]  ;;  %v778_v31 = vunpack.c.l.b16 %v562_v19  ;;  %v3873_v33 = vld [vmem:[#allocation7 + $0xc0] sm:$0xff]  ;;  %v3887_v45 = vld [vmem:[#allocation7 + $0x130] sm:$0xff]  ;;  %s4290_s9 = scalar_lea.hbm %s4289_s12, 64  ;;  %p4295_p9 = scmp.lt.s32.totalorder %s4289_s12, %s5229_s20 }
  0x9c   : > { %727 = vmatpush.bf16.msra.mxu0 %v3861_v46  ;;  %v4634_v35 = vld [vmem:[#allocation2 + $0x20] sm:$0xff]  ;;  %v4636_v36 = vld [vmem:[#allocation2 + $0x28] sm:$0xff]  ;;  %v664_v37 = vpack.c.b16 %v653_v23, %v652_v22  ;;  %v516_v46 = vsel %vm510_vm1, %v514_v41, %v515_v42  ;;  %v4650_v2 = vld [vmem:[#allocation2 + $0x30] sm:$0xff]  ;;  %p4291_p8 = scmp.ne.s32.totalorder %s4289_s12, %s4290_s9  ;;  %p4296_p1 = scmp.lt.s32.totalorder %s4294_s18, %s4290_s9 }
  0x9d   : > { %850 = vmatpush.bf16.msra.mxu1 %v3853_v47  ;;  %v775_v24 = vunpack.c.l.b16 %v559_v12  ;;  %v776_v25 = vunpack.c.l.b16 %v560_v13  ;;  %v915_v28 = vunpack.c.l.b16 %v591_v14  ;;  %v788_v40 = vpack.c.b16 %v778_v31, %v777_v30  ;;  %v3886_v50 = vld [vmem:[#allocation7 + $0x128] sm:$0xff]  ;;  %v3885_v59 = vld [vmem:[#allocation7 + $0x120] sm:$0xff]  ;;  %v4652_v3 = vld [vmem:[#allocation2 + $0x38] sm:$0xff] }
  0x9e   : > { %990 = vmatpush.bf16.msra.mxu2 %v3869_v48  ;;  %v468_v43 = vrot.slane %v4634_v35, 7  ;;  %v469_v44 = vrot.slane %v4636_v36, 7  ;;  %v552_v47 = vsel %vm510_vm1, %v515_v42, 0.0  ;;  %v471_v7 = vrot.slane %v4650_v2, 7  ;;  %v3883_v14 = vld [vmem:[#allocation7 + $0x110] sm:$0xff]  ;;  %p4292_p10 = pnand %p4291_p8, %p4525_p5  ;;  %p4297_p4 = por %p4296_p1, %p4295_p9 }
  0x9f   : > { %1112 = vmatpush.bf16.msra.mxu3 %v3877_v49  ;;  %v787_v38 = vpack.c.b16 %v776_v25, %v775_v24  ;;  %v927_v39 = vpack.c.b16 %v916_v29, %v915_v28  ;;  %v594_v56 = vpack.c.bf16 %v552_v47, %v552_v47  ;;  %v472_v8 = vrot.slane %v4652_v3, 7  ;;  %v4677_v28 = vld [vmem:[#allocation2 + $0x48] sm:$0xff] }
  0xa0   : > { %728 = vmatpush.bf16.msra.mxu0 %v3860_v54  ;;  %v470_v48 = vsel %vm461_vm0, %v468_v43, %v469_v44  ;;  %v504_v49 = vsel %vm461_vm0, 0.0, %v468_v43  ;;  %v578_v54 = vpack.c.bf16 %v4624_v53, %v4624_v53  ;;  %v505_v13 = vsel %vm461_vm0, 0.0, %v471_v7  ;;  %v3903_v43 = vld [vmem:[#allocation7 + $0x1b0] sm:$0xff]  ;;  %v3882_v44 = vld [vmem:[#allocation7 + $0x108] sm:$0xff]  ;;  %p4293_p7 = pneg %p4292_p10 }
  0xa1   : > { %851 = vmatpush.bf16.msra.mxu1 %v3852_v55  ;;  %v593_v55 = vpack.c.bf16 %v516_v46, %v516_v46  ;;  %v563_v57 = vpack.c.bf16 %v504_v49, %v504_v49  ;;  %v564_v58 = vpack.c.bf16 %v470_v48, %v470_v48  ;;  %v918_v63 = vunpack.c.l.b16 %v594_v56  ;;  %v3911_v46 = vld [vmem:[#allocation7 + $0x1f0] sm:$0xff]  ;;  %v3894_v56 = vld [vmem:[#allocation7 + $0x168] sm:$0xff] }
  0xa2   : > { %991 = vmatpush.bf16.msra.mxu2 %v3868_v60  ;;  %v654_v60 = vunpack.c.l.b16 %v577_v51  ;;  %v473_v12 = vsel %vm461_vm0, %v471_v7, %v472_v8  ;;  %v565_v19 = vpack.c.bf16 %v505_v13, %v505_v13  ;;  %v581_v47 = vpack.c.bf16 %v4650_v2, %v4650_v2  ;;  %v3900_v13 = vld [vmem:[#allocation7 + $0x198] sm:$0xff]  ;;  %p4298_p11 = pnand %p4297_p4, %p4293_p7 }
  0xa3   : > { %1113 = vmatpush.bf16.msra.mxu3 %v3876_v61  ;;  %v655_v61 = vunpack.c.l.b16 %v578_v54  ;;  %v917_v62 = vunpack.c.l.b16 %v593_v55  ;;  %v582_v48 = vpack.c.bf16 %v4652_v3, %v4652_v3  ;;  %v3902_v55 = vld [vmem:[#allocation7 + $0x1a8] sm:$0xff] }
  0xa4   : > { %729 = vmatpush.bf16.msra.mxu0 %v3859_v0  ;;  %v779_v0 = vunpack.c.l.b16 %v563_v57  ;;  %v781_v25 = vunpack.c.l.b16 %v565_v19  ;;  %v3910_v57 = vld [vmem:[#allocation7 + $0x1e8] sm:$0xff] }
  0xa5   : > { %852 = vmatpush.bf16.msra.mxu1 %v3851_v1  ;;  %v780_v1 = vunpack.c.l.b16 %v564_v58  ;;  %v4654_v52 = vpack.c.b16 %v655_v61, %v654_v60  ;;  %v4656_v53 = vpack.c.b16 %v918_v63, %v917_v62  ;;  %v658_v58 = vunpack.c.l.b16 %v581_v47 }
  0xa6   : > { %992 = vmatpush.bf16.msra.mxu2 %v3867_v5  ;;  %v517_v5 = vrot.slane %v4634_v35, 1 }
  0xa7   : > { %1114 = vmatpush.bf16.msra.mxu3 %v3875_v6  ;;  %v4658_v4 = vpack.c.b16 %v780_v1, %v779_v0  ;;  %v518_v6 = vrot.slane %v4636_v36, 1  ;;  %v4701_v0 = vld [vmem:[#allocation2 + $0x50] sm:$0xff]  ;;  %v3901_v1 = vld [vmem:[#allocation7 + $0x1a0] sm:$0xff] }
  0xa8   : > { %730 = vmatpush.bf16.msra.mxu0 %v3858_v15  ;;  %v579_v15 = vpack.c.bf16 %v4634_v35, %v4634_v35  ;;  %v475_v35 = vrot.slane %v4677_v28, 7 }
  0xa9   : > { %853 = vmatpush.bf16.msra.mxu1 %v3850_v16  ;;  %v519_v10 = vsel %vm510_vm1, %v517_v5, %v518_v6  ;;  %v553_v11 = vsel %vm510_vm1, %v518_v6, 0.0  ;;  %v580_v16 = vpack.c.bf16 %v4636_v36, %v4636_v36  ;;  %v3904_v36 = vld [vmem:[#allocation7 + $0x1b8] sm:$0xff]  ;;  %v3909_v5 = vld [vmem:[#allocation7 + $0x1e0] sm:$0xff] }
  0xaa   : > { %993 = vmatpush.bf16.msra.mxu2 %v3866_v20  ;;  %v595_v17 = vpack.c.bf16 %v519_v10, %v519_v10  ;;  %v596_v18 = vpack.c.bf16 %v553_v11, %v553_v11  ;;  %v566_v20 = vpack.c.bf16 %v473_v12, %v473_v12  ;;  %v524_v10 = vrot.slane %v4677_v28, 1 }
  0xab   : > { %1115 = vmatpush.bf16.msra.mxu3 %v3874_v21  ;;  %v656_v21 = vunpack.c.l.b16 %v579_v15  ;;  %v657_v22 = vunpack.c.l.b16 %v580_v16  ;;  %v477_v11 = vrot.slane %v4701_v0, 7  ;;  %v3908_v15 = vld [vmem:[#allocation7 + $0x1d8] sm:$0xff]  ;;  %v3881_v16 = vld [vmem:[#allocation7 + $0x100] sm:$0xff] }
  0xac   : > { %731 = vmatpush.bf16.msra.mxu0 %v3857_v26  ;;  %v919_v23 = vunpack.c.l.b16 %v595_v17  ;;  %v920_v24 = vunpack.c.l.b16 %v596_v18  ;;  %v782_v26 = vunpack.c.l.b16 %v566_v20  ;;  %v555_v18 = vsel %vm510_vm1, %v524_v10, 0.0 }
  0xad   : > { %854 = vmatpush.bf16.msra.mxu1 %v3849_v27  ;;  %v4675_v27 = vld [vmem:[#allocation2 + $0x40] sm:$0xff]  ;;  %v4679_v29 = vpack.c.b16 %v657_v22, %v656_v21  ;;  %v507_v20 = vsel %vm461_vm0, 0.0, %v477_v11  ;;  %v3899_v21 = vld [vmem:[#allocation7 + $0x190] sm:$0xff] }
  0xae   : > { %994 = vmatpush.bf16.msra.mxu2 %v3865_v32  ;;  %v4681_v30 = vpack.c.b16 %v920_v24, %v919_v23  ;;  %v4683_v31 = vpack.c.b16 %v782_v26, %v781_v25  ;;  %v520_v32 = vrot.slane %v4650_v2, 1  ;;  %v4703_v2 = vld [vmem:[#allocation2 + $0x58] sm:$0xff]  ;;  %v3891_v22 = vld [vmem:[#allocation7 + $0x150] sm:$0xff]  ;;  %v583_v24 = vpack.c.bf16 %v4675_v27, %v4675_v27 }
  0xaf   : > { %1116 = vmatpush.bf16.msra.mxu3 %v3873_v33  ;;  %732 = vmatmul.bf16.vlgmr.msra.gmra.mxu0 %v664_v37  ;;  %v521_v33 = vrot.slane %v4652_v3, 1  ;;  %v3896_v37 = vld [vmem:[#allocation7 + $0x178] sm:$0xff]  ;;  %v3893_v3 = vld [vmem:[#allocation7 + $0x160] sm:$0xff]  ;;  %v478_v12 = vrot.slane %v4703_v2, 7  ;;  %v3907_v23 = vld [vmem:[#allocation7 + $0x1d0] sm:$0xff]  ;;  %v584_v25 = vpack.c.bf16 %v4677_v28, %v4677_v28 }
  0xb0   : > { %1231 = vmatpush.bf16.msrb.mxu0 %v3888_v34  ;;  %855 = vmatmul.bf16.vlgmr.msra.gmra.mxu1 %v787_v38  ;;  %v474_v34 = vrot.slane %v4675_v27, 7  ;;  %v3912_v38 = vld [vmem:[#allocation7 + $0x1f8] sm:$0xff]  ;;  %v3897_v28 = vld [vmem:[#allocation7 + $0x180] sm:$0xff] }
  0xb1   : > { %995 = vmatmul.bf16.vlgmr.msra.gmra.mxu2 %v927_v39  ;;  %v522_v39 = vsel %vm510_vm1, %v520_v32, %v521_v33  ;;  %1353 = vmatpush.bf16.msrb.mxu1 %v3896_v37  ;;  %v479_v19 = vsel %vm461_vm0, %v477_v11, %v478_v12  ;;  %v600_v32 = vpack.c.bf16 %v555_v18, %v555_v18  ;;  %v3906_v37 = vld [vmem:[#allocation7 + $0x1c8] sm:$0xff] }
  0xb2   : > { %1117 = vmatmul.bf16.vlgmr.msra.gmra.mxu3 %v788_v40  ;;  %v476_v41 = vsel %vm461_vm0, %v474_v34, %v475_v35  ;;  %v506_v42 = vsel %vm461_vm0, 0.0, %v474_v34  ;;  %1475 = vmatpush.bf16.msrb.mxu2 %v3904_v36  ;;  %v597_v49 = vpack.c.bf16 %v522_v39, %v522_v39  ;;  %v570_v34 = vpack.c.bf16 %v479_v19, %v479_v19  ;;  %v3898_v35 = vld [vmem:[#allocation7 + $0x188] sm:$0xff]  ;;  %v3916_v19 = vld [vmem:[#allocation7 + $0x218] sm:$0xff] }
  0xb3   : > { %1597 = vmatpush.bf16.msrb.mxu3 %v3912_v38  ;;  %v567_v51 = vpack.c.bf16 %v506_v42, %v506_v42  ;;  %v568_v54 = vpack.c.bf16 %v476_v41, %v476_v41  ;;  %v3890_v36 = vld [vmem:[#allocation7 + $0x148] sm:$0xff]  ;;  %v660_v38 = vunpack.c.l.b16 %v583_v24  ;;  %v661_v39 = vunpack.c.l.b16 %v584_v25 }
  0xb4   : > { %1232 = vmatpush.bf16.msrb.mxu0 %v3887_v45  ;;  %v3895_v45 = vld [vmem:[#allocation7 + $0x170] sm:$0xff]  ;;  %v921_v60 = vunpack.c.l.b16 %v597_v49  ;;  %v924_v41 = vunpack.c.l.b16 %v600_v32  ;;  %v3914_v25 = vld [vmem:[#allocation7 + $0x208] sm:$0xff] }
  0xb5   : > { %1354 = vmatpush.bf16.msrb.mxu1 %v3895_v45  ;;  %v783_v62 = vunpack.c.l.b16 %v567_v51  ;;  %v784_v63 = vunpack.c.l.b16 %v568_v54  ;;  %v3889_v45 = vld [vmem:[#allocation7 + $0x140] sm:$0xff]  ;;  %v4731_v47 = vpack.c.b16 %v661_v39, %v660_v38  ;;  %v527_v51 = vrot.slane %v4703_v2, 1 }
  0xb6   : > { %1476 = vmatpush.bf16.msrb.mxu2 %v3903_v43  ;;  %v4727_v43 = vld [vmem:[#allocation2 + $0x60] sm:$0xff] }
  0xb7   : > { %1598 = vmatpush.bf16.msrb.mxu3 %v3911_v46  ;;  %v4709_v8 = vpack.c.b16 %v784_v63, %v783_v62  ;;  %v3905_v46 = vld [vmem:[#allocation7 + $0x1c0] sm:$0xff]  ;;  %v480_v54 = vrot.slane %v4727_v43, 7  ;;  %v585_v62 = vpack.c.bf16 %v4701_v0, %v4701_v0  ;;  %v586_v63 = vpack.c.bf16 %v4703_v2, %v4703_v2 }
  0xb8   : > { %1233 = vmatpush.bf16.msrb.mxu0 %v3886_v50  ;;  %v3917_v2 = vld [vmem:[#allocation7 + $0x220] sm:$0xff]  ;;  %v587_v39 = vpack.c.bf16 %v4727_v43, %v4727_v43 }
  0xb9   : > { %1355 = vmatpush.bf16.msrb.mxu1 %v3894_v56  ;;  %v3920_v56 = vld [vmem:[#allocation7 + $0x238] sm:$0xff]  ;;  %v663_v11 = vunpack.c.l.b16 %v586_v63 }
  0xba   : > { %1477 = vmatpush.bf16.msrb.mxu2 %v3902_v55 }
  0xbb   : > { %1599 = vmatpush.bf16.msrb.mxu3 %v3910_v57 }
  0xbc   : > { %1234 = vmatpush.bf16.msrb.mxu0 %v3885_v59  ;;  %v659_v59 = vunpack.c.l.b16 %v582_v48 }
  0xbd   : > { %1356 = vmatpush.bf16.msrb.mxu1 %v3893_v3 }
  0xbe   : > { %v4705_v6 = vpack.c.b16 %v659_v59, %v658_v58  ;;  %1478 = vmatpush.bf16.msrb.mxu2 %v3901_v1  ;;  %v556_v58 = vsel %vm510_vm1, %v527_v51, 0.0 }
  0xbf   : > { %737 = vmatmul.bf16.gmra.mxu0 %v4654_v52  ;;  %1600 = vmatpush.bf16.msrb.mxu3 %v3909_v5  ;;  %v602_v3 = vpack.c.bf16 %v556_v58, %v556_v58 }
  0xc0   : > { %860 = vmatmul.bf16.gmra.mxu1 %v788_v40  ;;  %1235 = vmatpush.bf16.msrb.mxu0 %v3884_v9  ;;  %v554_v40 = vsel %vm510_vm1, %v521_v33, 0.0  ;;  %v523_v9 = vrot.slane %v4675_v27, 1  ;;  %v569_v33 = vpack.c.bf16 %v507_v20, %v507_v20  ;;  %v786_v27 = vunpack.c.l.b16 %v570_v34 }
  0xc1   : > { %1000 = vmatmul.bf16.gmra.mxu2 %v4656_v53  ;;  %v598_v50 = vpack.c.bf16 %v554_v40, %v554_v40 }
  0xc2   : > { %1122 = vmatmul.bf16.gmra.mxu3 %v4658_v4  ;;  %v525_v17 = vsel %vm510_vm1, %v523_v9, %v524_v10  ;;  %1479 = vmatpush.bf16.msrb.mxu2 %v3900_v13  ;;  %v785_v42 = vunpack.c.l.b16 %v569_v33  ;;  %v662_v10 = vunpack.c.l.b16 %v585_v62  ;;  %v926_v13 = vunpack.c.l.b16 %v602_v3 }
  0xc3   : > { %v922_v61 = vunpack.c.l.b16 %v598_v50  ;;  %1601 = vmatpush.bf16.msrb.mxu3 %v3908_v15  ;;  %v599_v26 = vpack.c.bf16 %v525_v17, %v525_v17  ;;  %v526_v50 = vrot.slane %v4701_v0, 1  ;;  %v3918_v0 = vld [vmem:[#allocation7 + $0x228] sm:$0xff] }
  0xc4   : > { %1236 = vmatpush.bf16.msrb.mxu0 %v3883_v14  ;;  %v3892_v14 = vld [vmem:[#allocation7 + $0x158] sm:$0xff]  ;;  %v4735_v49 = vpack.c.b16 %v786_v27, %v785_v42  ;;  %v1179_v27 = vunpack.c.l.b16 %v587_v39 }
  0xc5   : > { %v4707_v7 = vpack.c.b16 %v922_v61, %v921_v60  ;;  %1357 = vmatpush.bf16.msrb.mxu1 %v3892_v14  ;;  %v923_v40 = vunpack.c.l.b16 %v599_v26  ;;  %v528_v57 = vsel %vm510_vm1, %v526_v50, %v527_v51  ;;  %v508_v60 = vsel %vm461_vm0, 0.0, %v480_v54  ;;  %v3919_v61 = vld [vmem:[#allocation7 + $0x230] sm:$0xff] }
  0xc6   : > { %1480 = vmatpush.bf16.msrb.mxu2 %v3899_v21  ;;  %v601_v1 = vpack.c.bf16 %v528_v57, %v528_v57  ;;  %v571_v5 = vpack.c.bf16 %v508_v60, %v508_v60  ;;  %v3915_v21 = vld [vmem:[#allocation7 + $0x210] sm:$0xff] }
  0xc7   : > { %1602 = vmatpush.bf16.msrb.mxu3 %v3907_v23  ;;  %v4733_v48 = vpack.c.b16 %v924_v41, %v923_v40  ;;  %v3913_v41 = vld [vmem:[#allocation7 + $0x200] sm:$0xff] }
  0xc8   : > { %1237 = vmatpush.bf16.msrb.mxu0 %v3882_v44  ;;  %v4729_v44 = vld [vmem:[#allocation2 + $0x68] sm:$0xff]  ;;  %v925_v12 = vunpack.c.l.b16 %v601_v1  ;;  %v1057_v14 = vunpack.c.l.b16 %v571_v5 }
  0xc9   : > { %1358 = vmatpush.bf16.msrb.mxu1 %v3891_v22  ;;  %v481_v55 = vrot.slane %v4729_v44, 7  ;;  %v588_v40 = vpack.c.bf16 %v4729_v44, %v4729_v44  ;;  %v530_v57 = vrot.slane %v4729_v44, 1 }
  0xca   : > { %1481 = vmatpush.bf16.msrb.mxu2 %v3898_v35  ;;  %v4755_v17 = vpack.c.b16 %v926_v13, %v925_v12 }
  0xcb   : > { %1603 = vmatpush.bf16.msrb.mxu3 %v3906_v37  ;;  %v482_v59 = vsel %vm461_vm0, %v480_v54, %v481_v55  ;;  %v557_v62 = vsel %vm510_vm1, %v530_v57, 0.0 }
  0xcc   : > { %1238 = vmatpush.bf16.msrb.mxu0 %v3881_v16  ;;  %v572_v9 = vpack.c.bf16 %v482_v59, %v482_v59  ;;  %v4753_v16 = vpack.c.b16 %v663_v11, %v662_v10  ;;  %v604_v5 = vpack.c.bf16 %v557_v62, %v557_v62 }
  0xcd   : > { %1359 = vmatpush.bf16.msrb.mxu1 %v3890_v36 }
  0xce   : > { %1482 = vmatpush.bf16.msrb.mxu2 %v3897_v28  ;;  %v1058_v15 = vunpack.c.l.b16 %v572_v9  ;;  %v1180_v28 = vunpack.c.l.b16 %v588_v40 }
  0xcf   : > { %742 = vmatmul.bf16.gmra.mxu0 %v4679_v29  ;;  %1604 = vmatpush.bf16.msrb.mxu3 %v3905_v46  ;;  %v4801_v46 = vld [vmem:[#allocation2 + $0x78] sm:$0xff] }
  0xd0   : > { %865 = vmatmul.bf16.gmra.mxu1 %v4658_v4  ;;  %1719 = vmatpush.bf16.msra.mxu0 %v3920_v56  ;;  %v4757_v18 = vpack.c.b16 %v1058_v15, %v1057_v14  ;;  %v1181_v54 = vpack.c.b16 %v1180_v28, %v1179_v27  ;;  %v529_v56 = vrot.slane %v4727_v43, 1  ;;  %v484_v59 = vrot.slane %v4801_v46, 7 }
  0xd1   : > { %1005 = vmatmul.bf16.gmra.mxu2 %v4681_v30  ;;  %1360 = vmatpush.bf16.msrb.mxu1 %v3889_v45  ;;  %v4799_v45 = vld [vmem:[#allocation2 + $0x70] sm:$0xff]  ;;  %v590_v14 = vpack.c.bf16 %v4801_v46, %v4801_v46 }
  0xd2   : > { %1127 = vmatmul.bf16.gmra.mxu3 %v4683_v31  ;;  %v483_v55 = vrot.slane %v4799_v45, 7  ;;  %v589_v13 = vpack.c.bf16 %v4799_v45, %v4799_v45 }
  0xd4   : > { %1720 = vmatpush.bf16.msra.mxu0 %v3919_v61  ;;  %v509_v60 = vsel %vm461_vm0, 0.0, %v483_v55  ;;  %v531_v61 = vsel %vm510_vm1, %v529_v56, %v530_v57  ;;  %v485_v43 = vsel %vm461_vm0, %v483_v55, %v484_v59 }
  0xd5   : > { %v573_v1 = vpack.c.bf16 %v509_v60, %v509_v60  ;;  %v603_v3 = vpack.c.bf16 %v531_v61, %v531_v61  ;;  %v574_v12 = vpack.c.bf16 %v485_v43, %v485_v43 }
  0xd8   : > { %1721 = vmatpush.bf16.msra.mxu0 %v3918_v0  ;;  %v1423_v0 = vunpack.c.l.b16 %v573_v1 }
  0xdc   : > { %1722 = vmatpush.bf16.msra.mxu0 %v3917_v2  ;;  %v1424_v2 = vunpack.c.l.b16 %v574_v12 }
  0xdf   : > { %747 = vmatmul.bf16.gmra.mxu0 %v4705_v6 }
  0xe0   : > { %870 = vmatmul.bf16.gmra.mxu1 %v4683_v31  ;;  %1723 = vmatpush.bf16.msra.mxu0 %v3916_v19  ;;  %v1545_v19 = vunpack.c.l.b16 %v589_v13  ;;  %v3928_v13 = vld [vmem:[#allocation9 + $0x38] sm:$0xff] }
  0xe1   : > { %1010 = vmatmul.bf16.gmra.mxu2 %v4707_v7 }
  0xe2   : > { %1132 = vmatmul.bf16.gmra.mxu3 %v4709_v8  ;;  %2239 = vmatpush.bf16.msra.mxu2 %v3928_v13 }
  0xe4   : > { %1724 = vmatpush.bf16.msra.mxu0 %v3915_v21 }
  0xe8   : > { %1725 = vmatpush.bf16.msra.mxu0 %v3914_v25 }
  0xec   : > { %1726 = vmatpush.bf16.msra.mxu0 %v3913_v41 }
  0xef   : > { %752 = vmatmul.bf16.gmra.mxu0 %v4731_v47 }
  0xf0   : > { %875 = vmatmul.bf16.gmra.mxu1 %v4709_v8 }
  0xf1   : > { %1015 = vmatmul.bf16.gmra.mxu2 %v4733_v48 }
  0xf2   : > { %1137 = vmatmul.bf16.gmra.mxu3 %v4735_v49 }
  0xff   : > { %757 = vmatmul.bf16.gmra.mxu0 %v4753_v16 }
 0x100   : > { %880 = vmatmul.bf16.gmra.mxu1 %v4735_v49 }
 0x101   : > { %1020 = vmatmul.bf16.gmra.mxu2 %v4755_v17 }
 0x102   : > { %1142 = vmatmul.bf16.gmra.mxu3 %v4757_v18 }
 0x10f   : > { %1239 = vmatmul.bf16.vlgmr.msrb.gmra.mxu0 %v4654_v52 }
 0x110   : > { %1361 = vmatmul.bf16.vlgmr.msrb.gmra.mxu1 %v4656_v53 }
 0x111   : > { %1483 = vmatmul.bf16.vlgmr.msrb.gmra.mxu2 %v4658_v4 }
 0x112   : > { %1605 = vmatmul.bf16.vlgmr.msrb.gmra.mxu3 %v4679_v29 }
 0x11f   : > { %1244 = vmatmul.bf16.gmra.mxu0 %v4679_v29 }
 0x120   : > { %1366 = vmatmul.bf16.gmra.mxu1 %v4681_v30 }
 0x121   : > { %1488 = vmatmul.bf16.gmra.mxu2 %v4683_v31 }
 0x122   : > { %1610 = vmatmul.bf16.gmra.mxu3 %v4705_v6 }
 0x12c   : > { %v733_v20 = vpop.f32.mrf.mxu0 }
 0x12d   : > { %v856_v52 = vpop.f32.mrf.mxu1 }
 0x12e   : > { %v857_v53 = vadd.f32 %v856_v52, %v733_v20  ;;  %v1546_v20 = vunpack.c.l.b16 %v590_v14 }
 0x12f   : > { %1249 = vmatmul.bf16.gmra.mxu0 %v4705_v6 }
 0x130   : > { %1371 = vmatmul.bf16.gmra.mxu1 %v4707_v7  ;;  %v1547_v25 = vpack.c.b16 %v1546_v20, %v1545_v19  ;;  %v3935_v20 = vld [vmem:[#allocation9 + $0x70] sm:$0xff] }
 0x131   : > { %1493 = vmatmul.bf16.gmra.mxu2 %v4709_v8 }
 0x132   : > { %1615 = vmatmul.bf16.gmra.mxu3 %v4731_v47 }
 0x134   : > { %v996_v4 = vpop.f32.mrf.mxu2  ;;  %v4775_v22 = vpop.f32.mrf.mxu0 }
 0x135   : > { %v1118_v29 = vpop.f32.mrf.mxu3  ;;  %v1026_v31 = vadd.f32 %v996_v4, %v857_v53  ;;  %v4777_v23 = vpop.f32.mrf.mxu1 }
 0x137   : > { %v4779_v24 = vadd.f32 %v1118_v29, %v1026_v31  ;;  %v1425_v31 = vpack.c.b16 %v1424_v2, %v1423_v0  ;;  %v3927_v0 = vld [vmem:[#allocation9 + $0x30] sm:$0xff]  ;;  %v533_v2 = vrot.slane %v4801_v46, 1  ;;  %v3934_v46 = vld [vmem:[#allocation9 + $0x68] sm:$0xff] }
 0x138   : > { %2240 = vmatpush.bf16.msra.mxu2 %v3927_v0 }
 0x13c   : > { %v4781_v26 = vpop.f32.mrf.mxu2  ;;  %v738_v32 = vpop.f32.mrf.mxu0 }
 0x13d   : > { %v4783_v6 = vpop.f32.mrf.mxu3  ;;  %v861_v33 = vpop.f32.mrf.mxu1 }
 0x13e   : > { %v862_v8 = vadd.f32 %v861_v33, %v738_v32 }
 0x13f   : > { %1254 = vmatmul.bf16.gmra.mxu0 %v4731_v47 }
 0x140   : > { %1376 = vmatmul.bf16.gmra.mxu1 %v4733_v48 }
 0x141   : > { %1498 = vmatmul.bf16.gmra.mxu2 %v4735_v49 }
 0x142   : > { %1620 = vmatmul.bf16.gmra.mxu3 %v4753_v16 }
 0x144   : > { %v1001_v34 = vpop.f32.mrf.mxu2  ;;  %v4789_v37 = vpop.f32.mrf.mxu0 }
 0x145   : > { %v1123_v35 = vpop.f32.mrf.mxu3  ;;  %v1028_v36 = vadd.f32 %v1001_v34, %v862_v8  ;;  %v4791_v38 = vpop.f32.mrf.mxu1 }
 0x147   : > { %v4797_v42 = vadd.f32 %v1123_v35, %v1028_v36 }
 0x14c   : > { %v4803_v47 = vpop.f32.mrf.mxu2  ;;  %v743_v50 = vpop.f32.mrf.mxu0 }
 0x14d   : > { %v4805_v49 = vpop.f32.mrf.mxu3  ;;  %v866_v51 = vpop.f32.mrf.mxu1 }
 0x14e   : > { %v867_v58 = vadd.f32 %v866_v51, %v743_v50 }
 0x14f   : > { %1259 = vmatmul.bf16.gmra.mxu0 %v4753_v16  ;;  %v1301_v16 = vunpack.c.l.b16 %v603_v3 }
 0x150   : > { %1381 = vmatmul.bf16.gmra.mxu1 %v4755_v17 }
 0x151   : > { %1503 = vmatmul.bf16.gmra.mxu2 %v4757_v18  ;;  %v1302_v18 = vunpack.c.l.b16 %v604_v5 }
 0x152   : > { %1625 = vmatmul.bf16.gmra.mxu3 %v1181_v54 }
 0x153   : > { %v1303_v53 = vpack.c.b16 %v1302_v18, %v1301_v16  ;;  %v3936_v16 = vld [vmem:[#allocation9 + $0x78] sm:$0xff] }
 0x154   : > { %v1006_v63 = vpop.f32.mrf.mxu2  ;;  %v4818_v10 = vpop.f32.mrf.mxu0  ;;  %3994 = vmatpush.bf16.msra.mxu3 %v3936_v16  ;;  %2138 = vmatpush.bf16.msra.mxu1 %v3936_v16  ;;  %v3930_v16 = vld [vmem:[#allocation9 + $0x48] sm:$0xff] }
 0x155   : > { %v1128_v44 = vpop.f32.mrf.mxu3  ;;  %v1030_v9 = vadd.f32 %v1006_v63, %v867_v58  ;;  %v4820_v11 = vpop.f32.mrf.mxu1 }
 0x157   : > { %v4826_v15 = vadd.f32 %v1128_v44, %v1030_v9 }
 0x158   : > { %3995 = vmatpush.bf16.msra.mxu3 %v3935_v20  ;;  %2139 = vmatpush.bf16.msra.mxu1 %v3935_v20 }
 0x15c   : > { %v4828_v52 = vpop.f32.mrf.mxu2  ;;  %v748_v4 = vpop.f32.mrf.mxu0  ;;  %3996 = vmatpush.bf16.msra.mxu3 %v3934_v46  ;;  %2140 = vmatpush.bf16.msra.mxu1 %v3934_v46  ;;  %v3976_v46 = vld [vmem:[#allocation9 + $0x1b8] sm:$0xff] }
 0x15d   : > { %v4830_v21 = vpop.f32.mrf.mxu3  ;;  %v871_v29 = vpop.f32.mrf.mxu1  ;;  %2789 = vmatpush.bf16.msrb.mxu0 %v3976_v46 }
 0x15e   : > { %v872_v32 = vadd.f32 %v871_v29, %v748_v4  ;;  %v558_v4 = vsel %vm510_vm1, %v533_v2, 0.0 }
 0x15f   : > { %1264 = vmatmul.bf16.gmra.mxu0 %v1181_v54 }
 0x160   : > { %1386 = vmatmul.bf16.gmra.mxu1 %v1303_v53 }
 0x161   : > { %1508 = vmatmul.bf16.gmra.mxu2 %v1425_v31  ;;  %v606_v31 = vpack.c.bf16 %v558_v4, %v558_v4  ;;  %v859_v4 = vadd.f32 %v4777_v23, %v4775_v22 }
 0x162   : > { %1630 = vmatmul.bf16.gmra.mxu3 %v1547_v25 }
 0x164   : > { %v1011_v33 = vpop.f32.mrf.mxu2  ;;  %v4832_v35 = vpop.f32.mrf.mxu0 }
 0x165   : > { %v1133_v8 = vpop.f32.mrf.mxu3  ;;  %v1032_v34 = vadd.f32 %v1011_v33, %v872_v32  ;;  %v4834_v36 = vpop.f32.mrf.mxu1  ;;  %v1668_v32 = vunpack.c.l.b16 %v606_v31  ;;  %v3921_v31 = vld [vmem:[#allocation9] sm:$0xff] }
 0x167   : > { %v1154_v39 = vadd.f32 %v1133_v8, %v1032_v34 }
 0x16c   : > { %v4836_v40 = vpop.f32.mrf.mxu2  ;;  %v753_v27 = vpop.f32.mrf.mxu0 }
 0x16d   : > { %v4838_v41 = vpop.f32.mrf.mxu3  ;;  %v876_v28 = vpop.f32.mrf.mxu1 }
 0x16e   : > { %v877_v50 = vadd.f32 %v876_v28, %v753_v27 }
 0x16f   : > { %1727 = vmatmul.bf16.vlgmr.msra.gmra.mxu0 %v4681_v30 }
 0x174   : > { %v1016_v51 = vpop.f32.mrf.mxu2  ;;  %v4841_v56 = vpop.f32.mrf.mxu0 }
 0x175   : > { %v1138_v54 = vpop.f32.mrf.mxu3  ;;  %v1034_v55 = vadd.f32 %v1016_v51, %v877_v50  ;;  %v4843_v57 = vpop.f32.mrf.mxu1  ;;  %v3933_v50 = vld [vmem:[#allocation9 + $0x60] sm:$0xff]  ;;  %v3924_v51 = vld [vmem:[#allocation9 + $0x18] sm:$0xff] }
 0x176   : > { %3997 = vmatpush.bf16.msra.mxu3 %v3933_v50  ;;  %2141 = vmatpush.bf16.msra.mxu1 %v3933_v50 }
 0x177   : > { %v4845_v58 = vadd.f32 %v1138_v54, %v1034_v55 }
 0x17c   : > { %v4847_v59 = vpop.f32.mrf.mxu2  ;;  %v758_v61 = vpop.f32.mrf.mxu0 }
 0x17d   : > { %v4849_v60 = vpop.f32.mrf.mxu3  ;;  %v881_v62 = vpop.f32.mrf.mxu1 }
 0x17e   : > { %v882_v43 = vadd.f32 %v881_v62, %v758_v61 }
 0x17f   : > { %1732 = vmatmul.bf16.gmra.mxu0 %v4707_v7 }
 0x184   : > { %v1021_v63 = vpop.f32.mrf.mxu2  ;;  %v4852_v1 = vpop.f32.mrf.mxu0 }
 0x185   : > { %v1143_v30 = vpop.f32.mrf.mxu3  ;;  %v1036_v44 = vadd.f32 %v1021_v63, %v882_v43  ;;  %v883_v34 = vpop.f32.mrf.mxu1  ;;  %v3932_v63 = vld [vmem:[#allocation9 + $0x58] sm:$0xff] }
 0x186   : > { %3998 = vmatpush.bf16.msra.mxu3 %v3932_v63  ;;  %2142 = vmatpush.bf16.msra.mxu1 %v3932_v63 }
 0x187   : > { %v4854_v3 = vadd.f32 %v1143_v30, %v1036_v44 }
 0x18c   : > { %v1240_v5 = vpop.f32.mrf.mxu0  ;;  %v1023_v27 = vpop.f32.mrf.mxu2 }
 0x18d   : > { %v4857_v9 = vadd.f32 %v1240_v5, %v4779_v24  ;;  %v532_v24 = vrot.slane %v4799_v45, 1  ;;  %v1145_v54 = vpop.f32.mrf.mxu3  ;;  %v1362_v55 = vpop.f32.mrf.mxu1  ;;  %v3931_v5 = vld [vmem:[#allocation9 + $0x50] sm:$0xff] }
 0x18e   : > { %2143 = vmatpush.bf16.msra.mxu1 %v3931_v5  ;;  %3999 = vmatpush.bf16.msra.mxu3 %v3931_v5  ;;  %v3974_v5 = vld [vmem:[#allocation9 + $0x1a8] sm:$0xff] }
 0x18f   : > { %1737 = vmatmul.bf16.gmra.mxu0 %v4733_v48 }
 0x192   : > { %2144 = vmatpush.bf16.msra.mxu1 %v3930_v16  ;;  %4000 = vmatpush.bf16.msra.mxu3 %v3930_v16  ;;  %v3949_v16 = vld [vmem:[#allocation9 + $0xe0] sm:$0xff] }
 0x194   : > { %v4860_v12 = vpop.f32.mrf.mxu0  ;;  %v1484_v43 = vpop.f32.mrf.mxu2 }
 0x195   : > { %v1364_v44 = vpop.f32.mrf.mxu1 }
 0x19c   : > { %v1245_v14 = vpop.f32.mrf.mxu0  ;;  %v1486_v13 = vpop.f32.mrf.mxu2 }
 0x19d   : > { %v4863_v7 = vadd.f32 %v1245_v14, %v4797_v42  ;;  %v3926_v42 = vld [vmem:[#allocation9 + $0x28] sm:$0xff]  ;;  %v3923_v14 = vld [vmem:[#allocation9 + $0x10] sm:$0xff] }
 0x19e   : > { %2241 = vmatpush.bf16.msra.mxu2 %v3926_v42  ;;  %v1367_v42 = vpop.f32.mrf.mxu1 }
 0x19f   : > { %1742 = vmatmul.bf16.gmra.mxu0 %v4755_v17  ;;  %v534_v17 = vsel %vm510_vm1, %v532_v24, %v533_v2  ;;  %v3922_v2 = vld [vmem:[#allocation9 + $0x8] sm:$0xff] }
 0x1a0   : > { %v605_v29 = vpack.c.bf16 %v534_v17, %v534_v17  ;;  %v3929_v17 = vld [vmem:[#allocation9 + $0x40] sm:$0xff] }
 0x1a1   : > { %2145 = vmatpush.bf16.msra.mxu1 %v3929_v17  ;;  %4001 = vmatpush.bf16.msra.mxu3 %v3929_v17 }
 0x1a2   : > { %v1667_v45 = vunpack.c.l.b16 %v605_v29 }
 0x1a4   : > { %v4866_v18 = vpop.f32.mrf.mxu0  ;;  %v1489_v29 = vpop.f32.mrf.mxu2 }
 0x1a6   : > { %v1369_v50 = vpop.f32.mrf.mxu1 }
 0x1ac   : > { %v1250_v48 = vpop.f32.mrf.mxu0 }
 0x1ad   : > { %v4871_v19 = vadd.f32 %v1250_v48, %v4826_v15  ;;  %v1669_v15 = vpack.c.b16 %v1668_v32, %v1667_v45 }
 0x1af   : > { %1747 = vmatmul.bf16.gmra.mxu0 %v1303_v53  ;;  %v3925_v53 = vld [vmem:[#allocation9 + $0x20] sm:$0xff] }
 0x1b0   : > { %2242 = vmatpush.bf16.msra.mxu2 %v3925_v53 }
 0x1b4   : > { %v4875_v25 = vpop.f32.mrf.mxu0  ;;  %2243 = vmatpush.bf16.msra.mxu2 %v3924_v51  ;;  %v1812_v51 = vstv %s1811_s4  ;;  %s3079_s4 = scalar_lea.sflag [#allocation6], %s4550_s2 }
 0x1b5   : > { %vm1813_vm2 = vcmp.eq.s32.totalorder %v1812_v51, 1 }
 0x1b8   : > { %2244 = vmatpush.bf16.msra.mxu2 %v3923_v14 }
 0x1bc   : > { %v1255_v33 = vpop.f32.mrf.mxu0  ;;  %2245 = vmatpush.bf16.msra.mxu2 %v3922_v2 }
 0x1bd   : > { %v4877_v8 = vadd.f32 %v1255_v33, %v1154_v39  ;;  %v1606_v39 = vpop.f32.mrf.mxu3 }
 0x1bf   : > { %1752 = vmatmul.bf16.gmra.mxu0 %v1669_v15  ;;  %v1392_v15 = vadd.f32 %v1362_v55, %v4857_v9  ;;  %v4903_v9 = vld [vmem:[%s5225_s17] ss:$0 sm:$0xff]  ;;  %v3950_v55 = vld [vmem:[#allocation9 + $0xe8] sm:$0xff] }
 0x1c0   : > { %2246 = vmatpush.bf16.msra.mxu2 %v3921_v31  ;;  %v4912_v31 = vpop.f32.mrf.mxu1 }
 0x1c1   : > { %v1514_v23 = vadd.f32 %v1484_v43, %v1392_v15 }
 0x1c4   : > { %v4879_v28 = vpop.f32.mrf.mxu0 }
 0x1c5   : > { %v1608_v0 = vpop.f32.mrf.mxu3 }
 0x1cc   : > { %v1260_v61 = vpop.f32.mrf.mxu0 }
 0x1cd   : > { %v4882_v62 = vadd.f32 %v1260_v61, %v4845_v58  ;;  %v884_v58 = vadd.f32 %v883_v34, %v4852_v1  ;;  %v1027_v1 = vadd.f32 %v4781_v26, %v859_v4  ;;  %v1611_v53 = vpop.f32.mrf.mxu3  ;;  %v3951_v34 = vld [vmem:[#allocation9 + $0xf0] sm:$0xff]  ;;  %v1491_v61 = vpop.f32.mrf.mxu2 }
 0x1cf   : > { %v1037_v20 = vadd.f32 %v1023_v27, %v884_v58  ;;  %v1149_v22 = vadd.f32 %v4783_v6, %v1027_v1  ;;  %v3975_v27 = vld [vmem:[#allocation9 + $0x1b0] sm:$0xff]  ;;  %v4392_v58 = vmov 0.0   ;;  %v3948_v1 = vld [vmem:[#allocation9 + $0xd8] sm:$0xff] }
 0x1d0   : > { %2790 = vmatpush.bf16.msrb.mxu0 %v3975_v27  ;;  %v3546_v2 = vsel %vm1813_vm2, 1.0, %v4392_v58 }
 0x1d1   : > { %v1159_v45 = vadd.f32 %v1145_v54, %v1037_v20  ;;  %v1271_v26 = vadd.f32 %v4860_v12, %v1149_v22  ;;  %v1636_v54 = vadd.f32 %v1606_v39, %v1514_v23  ;;  %v864_v39 = vadd.f32 %v4791_v38, %v4789_v37  ;;  %v3973_v20 = vld [vmem:[#allocation9 + $0x1a0] sm:$0xff] }
 0x1d2   : > { %v1394_v37 = vadd.f32 %v1367_v42, %v4863_v7 }
 0x1d3   : > { %v1393_v6 = vadd.f32 %v1364_v44, %v1271_v26  ;;  %v1029_v44 = vadd.f32 %v4803_v47, %v864_v39  ;;  %v869_v39 = vadd.f32 %v4820_v11, %v4818_v10  ;;  %v3969_v10 = vld [vmem:[#allocation9 + $0x180] sm:$0xff] }
 0x1d4   : > { %v4884_v30 = vpop.f32.mrf.mxu0  ;;  %2791 = vmatpush.bf16.msrb.mxu0 %v3974_v5  ;;  %v1516_v22 = vadd.f32 %v1489_v29, %v1394_v37 }
 0x1d5   : > { %v1515_v12 = vadd.f32 %v1486_v13, %v1393_v6  ;;  %v1151_v46 = vadd.f32 %v4805_v49, %v1029_v44  ;;  %v4916_v15 = vpop.f32.mrf.mxu2  ;;  %v3970_v6 = vld [vmem:[#allocation9 + $0x188] sm:$0xff]  ;;  %v1031_v11 = vadd.f32 %v4828_v52, %v869_v39  ;;  %v1396_v52 = vadd.f32 %v4912_v31, %v4871_v19 }
 0x1d6   : > { %v1638_v51 = vadd.f32 %v1611_v53, %v1516_v22 }
 0x1d7   : > { %v1637_v4 = vadd.f32 %v1608_v0, %v1515_v12  ;;  %v3947_v0 = vld [vmem:[#allocation9 + $0xd0] sm:$0xff]  ;;  %v1273_v23 = vadd.f32 %v4866_v18, %v1151_v46 }
 0x1d8   : > { %2792 = vmatpush.bf16.msrb.mxu0 %v3973_v20 }
 0x1dc   : > { %v1265_v24 = vpop.f32.mrf.mxu0 }
 0x1dd   : > { %v4888_v48 = vadd.f32 %v1265_v24, %v4854_v3  ;;  %v3952_v3 = vld [vmem:[#allocation9 + $0xf8] sm:$0xff]  ;;  %v4908_v24 = vpop.f32.mrf.mxu3 }
 0x1de   : > { %2465 = vmatpush.bf16.msrb.mxu1 %v3952_v3  ;;  %v3972_v3 = vld [vmem:[#allocation9 + $0x198] sm:$0xff] }
 0x1df   : > { %2793 = vmatpush.bf16.msrb.mxu0 %v3972_v3 }
 0x1e2   : > { %2466 = vmatpush.bf16.msrb.mxu1 %v3951_v34  ;;  %v3971_v34 = vld [vmem:[#allocation9 + $0x190] sm:$0xff] }
 0x1e3   : > { %2794 = vmatpush.bf16.msrb.mxu0 %v3971_v34 }
 0x1e4   : > { %v1267_v32 = vpop.f32.mrf.mxu0 }
 0x1e5   : > { %v4894_v33 = vadd.f32 %v1267_v32, %v1159_v45  ;;  %v4921_v7 = vpop.f32.mrf.mxu3 }
 0x1e6   : > { %2467 = vmatpush.bf16.msrb.mxu1 %v3950_v55  ;;  %v1395_v55 = vadd.f32 %v1369_v50, %v1273_v23 }
 0x1e7   : > { %2795 = vmatpush.bf16.msrb.mxu0 %v3970_v6 }
 0x1e8   : > { %v1517_v20 = vadd.f32 %v1491_v61, %v1395_v55  ;;  %v3943_v55 = vld [vmem:[#allocation9 + $0xb0] sm:$0xff] }
 0x1ea   : > { %2468 = vmatpush.bf16.msrb.mxu1 %v3949_v16  ;;  %v1639_v34 = vadd.f32 %v4908_v24, %v1517_v20 }
 0x1eb   : > { %2796 = vmatpush.bf16.msrb.mxu0 %v3969_v10 }
 0x1ec   : > { %v1728_v63 = vpop.f32.mrf.mxu0 }
 0x1ed   : > { %v1758_v43 = vadd.f32 %v1728_v63, %v1636_v54  ;;  %v3946_v54 = vld [vmem:[#allocation9 + $0xc8] sm:$0xff] }
 0x1ee   : > { %2469 = vmatpush.bf16.msrb.mxu1 %v3948_v1 }
 0x1ef   : > { %v1774_v14 = vadd.f32 %v4903_v9, %v1758_v43  ;;  %v4923_v43 = vpop.f32.mrf.mxu1 }
 0x1f1   : > { %v1865_v17 = vmax.f32 %v1774_v14, 0.0 }
 0x1f2   : > { %2470 = vmatpush.bf16.msrb.mxu1 %v3947_v0 }
 0x1f3   : > { %v1901_v13 = vmul.f32 %v3546_v2, %v1865_v17 }
 0x1f4   : > { %v1730_v45 = vpop.f32.mrf.mxu0 }
 0x1f5   : > { %v1925_v38 = vrot.slane %v1901_v13, 7  ;;  %v1759_v32 = vadd.f32 %v1730_v45, %v1637_v4  ;;  %v2009_v42 = vpack.c.bf16 %v1901_v13, %v1901_v13  ;;  %v1961_v63 = vrot.slane %v1901_v13, 1  ;;  %v3945_v4 = vld [vmem:[#allocation9 + $0xc0] sm:$0xff]  ;;  %v4930_v13 = vpop.f32.mrf.mxu2 }
 0x1f6   : > { %2471 = vmatpush.bf16.msrb.mxu1 %v3946_v54 }
 0x1f7   : > { %v1775_v47 = vadd.f32 %v4903_v9, %v1759_v32  ;;  %v1955_v27 = vsel %vm461_vm0, 0.0, %v1925_v38  ;;  %v2074_v17 = vunpack.c.l.b16 %v2009_v42  ;;  %v3960_v32 = vld [vmem:[#allocation9 + $0x138] sm:$0xff]  ;;  %v1377_v24 = vpop.f32.mrf.mxu1 }
 0x1f8   : > { %v1997_v29 = vpack.c.bf16 %v1955_v27, %v1955_v27  ;;  %2573 = vmatpush.bf16.msrb.mxu2 %v3960_v32  ;;  %v3959_v27 = vld [vmem:[#allocation9 + $0x130] sm:$0xff] }
 0x1f9   : > { %v1866_v26 = vmax.f32 %v1775_v47, 0.0 }
 0x1fa   : > { %v2175_v61 = vunpack.c.l.b16 %v1997_v29  ;;  %2472 = vmatpush.bf16.msrb.mxu1 %v3945_v4  ;;  %v1153_v29 = vadd.f32 %v4830_v21, %v1031_v11 }
 0x1fb   : > { %v1902_v49 = vmul.f32 %v3546_v2, %v1866_v26  ;;  %v1618_v26 = vpop.f32.mrf.mxu3 }
 0x1fc   : > { %v1733_v5 = vpop.f32.mrf.mxu0  ;;  %2574 = vmatpush.bf16.msrb.mxu2 %v3959_v27  ;;  %v1275_v19 = vadd.f32 %v4875_v25, %v1153_v29 }
 0x1fd   : > { %v1926_v18 = vrot.slane %v1902_v49, 7  ;;  %v1962_v12 = vrot.slane %v1902_v49, 1  ;;  %v2010_v14 = vpack.c.bf16 %v1902_v49, %v1902_v49  ;;  %v1760_v16 = vadd.f32 %v1733_v5, %v1638_v51  ;;  %v1499_v39 = vpop.f32.mrf.mxu2 }
 0x1fe   : > { %v1518_v5 = vadd.f32 %v4916_v15, %v1396_v52 }
 0x1ff   : > { %v1927_v53 = vsel %vm461_vm0, %v1925_v38, %v1926_v18  ;;  %v1963_v50 = vsel %vm510_vm1, %v1961_v63, %v1962_v12  ;;  %v1991_v2 = vsel %vm510_vm1, %v1962_v12, 0.0  ;;  %v2075_v44 = vunpack.c.l.b16 %v2010_v14  ;;  %v3944_v38 = vld [vmem:[#allocation9 + $0xb8] sm:$0xff]  ;;  %v3942_v14 = vld [vmem:[#allocation9 + $0xa8] sm:$0xff]  ;;  %v1379_v52 = vpop.f32.mrf.mxu1 }
 0x200   : > { %v1998_v1 = vpack.c.bf16 %v1927_v53, %v1927_v53  ;;  %v2021_v45 = vpack.c.bf16 %v1963_v50, %v1963_v50  ;;  %v2022_v3 = vpack.c.bf16 %v1991_v2, %v1991_v2  ;;  %v1776_v37 = vadd.f32 %v4903_v9, %v1760_v16  ;;  %2357 = vmatpush.bf16.msrb.mxu3 %v3944_v38  ;;  %v3958_v53 = vld [vmem:[#allocation9 + $0x128] sm:$0xff] }
 0x201   : > { %v2082_v46 = vpack.c.b16 %v2075_v44, %v2074_v17  ;;  %v1640_v16 = vadd.f32 %v4921_v7, %v1518_v5  ;;  %v1397_v50 = vadd.f32 %v4923_v43, %v1275_v19  ;;  %2575 = vmatpush.bf16.msrb.mxu2 %v3958_v53  ;;  %v3955_v53 = vld [vmem:[#allocation9 + $0x110] sm:$0xff] }
 0x202   : > { %v4934_v22 = vunpack.c.l.b16 %v2022_v3  ;;  %v1867_v47 = vmax.f32 %v1776_v37, 0.0  ;;  %v2176_v0 = vunpack.c.l.b16 %v1998_v1  ;;  %v4936_v23 = vunpack.c.l.b16 %v2021_v45  ;;  %v3941_v3 = vld [vmem:[#allocation9 + $0xa0] sm:$0xff] }
 0x203   : > { %2146 = vmatmul.bf16.vlgmr.msra.gmra.mxu1 %v2082_v46  ;;  %v1621_v37 = vpop.f32.mrf.mxu3 }
 0x204   : > { %v1735_v42 = vpop.f32.mrf.mxu0  ;;  %v2183_v51 = vpack.c.b16 %v2176_v0, %v2175_v61  ;;  %v1928_v49 = vrot.slane %v1867_v47, 7  ;;  %v2301_v63 = vpack.c.b16 %v4934_v22, %v4936_v23  ;;  %2358 = vmatpush.bf16.msrb.mxu3 %v3943_v55  ;;  %v2011_v31 = vpack.c.bf16 %v1867_v47, %v1867_v47  ;;  %v3963_v22 = vld [vmem:[#allocation9 + $0x150] sm:$0xff] }
 0x205   : > { %v1761_v54 = vadd.f32 %v1735_v42, %v1639_v34  ;;  %v1964_v20 = vrot.slane %v1867_v47, 1  ;;  %v1519_v61 = vadd.f32 %v4930_v13, %v1397_v50  ;;  %v874_v47 = vadd.f32 %v4834_v36, %v4832_v35  ;;  %v3957_v13 = vld [vmem:[#allocation9 + $0x120] sm:$0xff]  ;;  %v1501_v36 = vpop.f32.mrf.mxu2 }
 0x206   : > { %2247 = vmatmul.bf16.vlgmr.msra.gmra.mxu2 %v2183_v51  ;;  %v1956_v12 = vsel %vm461_vm0, 0.0, %v1928_v49  ;;  %v2076_v44 = vunpack.c.l.b16 %v2011_v31  ;;  %v3940_v51 = vld [vmem:[#allocation9 + $0x98] sm:$0xff]  ;;  %v1398_v35 = vadd.f32 %v1377_v24, %v4877_v8 }
 0x207   : > { %v1777_v6 = vadd.f32 %v4903_v9, %v1761_v54  ;;  %v1999_v4 = vpack.c.bf16 %v1956_v12, %v1956_v12  ;;  %v1033_v54 = vadd.f32 %v4836_v40, %v874_v47  ;;  %v1641_v29 = vadd.f32 %v1618_v26, %v1519_v61  ;;  %2576 = vmatpush.bf16.msrb.mxu2 %v3957_v13  ;;  %v1382_v50 = vpop.f32.mrf.mxu1  ;;  %v3954_v61 = vld [vmem:[#allocation9 + $0x108] sm:$0xff] }
 0x208   : > { %2359 = vmatpush.bf16.msrb.mxu3 %v3942_v14  ;;  %v1520_v40 = vadd.f32 %v1499_v39, %v1398_v35  ;;  %v3956_v14 = vld [vmem:[#allocation9 + $0x118] sm:$0xff] }
 0x209   : > { %v1868_v18 = vmax.f32 %v1777_v6, 0.0  ;;  %v2177_v0 = vunpack.c.l.b16 %v1999_v4  ;;  %v1155_v12 = vadd.f32 %v4838_v41, %v1033_v54 }
 0x20b   : > { %v1929_v21 = vrot.slane %v1868_v18, 7  ;;  %v1965_v17 = vrot.slane %v1868_v18, 1  ;;  %v2012_v15 = vpack.c.bf16 %v1868_v18, %v1868_v18  ;;  %v3939_v18 = vld [vmem:[#allocation9 + $0x90] sm:$0xff]  ;;  %2577 = vmatpush.bf16.msrb.mxu2 %v3956_v14 }
 0x20c   : > { %v1738_v2 = vpop.f32.mrf.mxu0  ;;  %2360 = vmatpush.bf16.msrb.mxu3 %v3941_v3 }
 0x20d   : > { %v1762_v25 = vadd.f32 %v1738_v2, %v1640_v16  ;;  %v2077_v1 = vunpack.c.l.b16 %v2012_v15  ;;  %v1930_v45 = vsel %vm461_vm0, %v1928_v49, %v1929_v21  ;;  %v1966_v7 = vsel %vm510_vm1, %v1964_v20, %v1965_v17  ;;  %v1623_v20 = vpop.f32.mrf.mxu3 }
 0x20e   : > { %v2000_v32 = vpack.c.bf16 %v1930_v45, %v1930_v45  ;;  %v1992_v10 = vsel %vm510_vm1, %v1965_v17, 0.0  ;;  %v2023_v11 = vpack.c.bf16 %v1966_v7, %v1966_v7  ;;  %v1277_v16 = vadd.f32 %v4879_v28, %v1155_v12  ;;  %v3938_v17 = vld [vmem:[#allocation9 + $0x88] sm:$0xff] }
 0x20f   : > { %v1778_v43 = vadd.f32 %v4903_v9, %v1762_v25  ;;  %v4955_v46 = vpack.c.b16 %v2077_v1, %v2076_v44  ;;  %v2024_v38 = vpack.c.bf16 %v1992_v10, %v1992_v10  ;;  %v1642_v15 = vadd.f32 %v1621_v37, %v1520_v40  ;;  %2578 = vmatpush.bf16.msrb.mxu2 %v3955_v53  ;;  %v1504_v37 = vpop.f32.mrf.mxu2  ;;  %v1384_v12 = vpop.f32.mrf.mxu1 }
 0x210   : > { %v2178_v34 = vunpack.c.l.b16 %v2000_v32  ;;  %v2295_v27 = vunpack.c.l.b16 %v2023_v11  ;;  %2361 = vmatpush.bf16.msrb.mxu3 %v3940_v51  ;;  %v1399_v4 = vadd.f32 %v1379_v52, %v1277_v16  ;;  %v3937_v32 = vld [vmem:[#allocation9 + $0x80] sm:$0xff]  ;;  %v879_v52 = vadd.f32 %v4843_v57, %v4841_v56 }
 0x211   : > { %v1869_v42 = vmax.f32 %v1778_v43, 0.0  ;;  %v2296_v49 = vunpack.c.l.b16 %v2024_v38  ;;  %v1400_v56 = vadd.f32 %v1382_v50, %v4882_v62 }
 0x212   : > { %v4960_v55 = vpack.c.b16 %v2178_v34, %v2177_v0  ;;  %v1521_v47 = vadd.f32 %v1501_v36, %v1399_v4 }
 0x213   : > { %2151 = vmatmul.bf16.gmra.mxu1 %v4955_v46  ;;  %v4963_v5 = vpack.c.b16 %v2296_v49, %v2295_v27  ;;  %v1931_v19 = vrot.slane %v1869_v42, 7  ;;  %v2013_v21 = vpack.c.bf16 %v1869_v42, %v1869_v42  ;;  %v1967_v41 = vrot.slane %v1869_v42, 1  ;;  %2579 = vmatpush.bf16.msrb.mxu2 %v3954_v61 }
 0x214   : > { %v1740_v6 = vpop.f32.mrf.mxu0  ;;  %2362 = vmatpush.bf16.msrb.mxu3 %v3939_v18  ;;  %v1522_v16 = vadd.f32 %v1504_v37, %v1400_v56  ;;  %v3981_v37 = vld [vmem:[#allocation9 + $0x1e0] sm:$0xff] }
 0x215   : > { %v1763_v31 = vadd.f32 %v1740_v6, %v1641_v29  ;;  %v1957_v8 = vsel %vm461_vm0, 0.0, %v1931_v19  ;;  %v2078_v1 = vunpack.c.l.b16 %v2013_v21  ;;  %v1035_v29 = vadd.f32 %v4847_v59, %v879_v52  ;;  %v1626_v35 = vpop.f32.mrf.mxu3  ;;  %v3953_v6 = vld [vmem:[#allocation9 + $0x100] sm:$0xff]  ;;  %v3968_v59 = vld [vmem:[#allocation9 + $0x178] sm:$0xff]  ;;  %v3983_v21 = vld [vmem:[#allocation9 + $0x1f0] sm:$0xff] }
 0x216   : > { %2252 = vmatmul.bf16.gmra.mxu2 %v4960_v55  ;;  %v2001_v25 = vpack.c.bf16 %v1957_v8, %v1957_v8  ;;  %v1644_v53 = vadd.f32 %v1626_v35, %v1522_v16 }
 0x217   : > { %v1779_v26 = vadd.f32 %v4903_v9, %v1763_v31  ;;  %v3984_v31 = vld [vmem:[#allocation9 + $0x1f8] sm:$0xff]  ;;  %2580 = vmatpush.bf16.msrb.mxu2 %v3953_v6  ;;  %v1506_v8 = vpop.f32.mrf.mxu2 }
 0x218   : > { %2363 = vmatpush.bf16.msrb.mxu3 %v3938_v17  ;;  %v2179_v42 = vunpack.c.l.b16 %v2001_v25  ;;  %2897 = vmatpush.bf16.msra.mxu1 %v3984_v31  ;;  %v3989_v31 = vld [vmem:[#allocation9 + $0x220] sm:$0xff] }
 0x219   : > { %v1870_v24 = vmax.f32 %v1779_v26, 0.0  ;;  %v1157_v26 = vadd.f32 %v4849_v60, %v1035_v29  ;;  %v3991_v60 = vld [vmem:[#allocation9 + $0x230] sm:$0xff]  ;;  %v3966_v29 = vld [vmem:[#allocation9 + $0x168] sm:$0xff] }
 0x21b   : > { %v1932_v39 = vrot.slane %v1870_v24, 7  ;;  %v1968_v2 = vrot.slane %v1870_v24, 1  ;;  %v2014_v44 = vpack.c.bf16 %v1870_v24, %v1870_v24  ;;  %v1279_v62 = vadd.f32 %v4884_v30, %v1157_v26 }
 0x21c   : > { %v1743_v45 = vpop.f32.mrf.mxu0  ;;  %2364 = vmatpush.bf16.msrb.mxu3 %v3937_v32  ;;  %2898 = vmatpush.bf16.msra.mxu1 %v3983_v21  ;;  %v3967_v32 = vld [vmem:[#allocation9 + $0x170] sm:$0xff]  ;;  %v3965_v21 = vld [vmem:[#allocation9 + $0x160] sm:$0xff] }
 0x21d   : > { %v1933_v28 = vsel %vm461_vm0, %v1931_v19, %v1932_v39  ;;  %v2079_v3 = vunpack.c.l.b16 %v2014_v44  ;;  %v1764_v7 = vadd.f32 %v1743_v45, %v1642_v15  ;;  %v1969_v10 = vsel %vm510_vm1, %v1967_v41, %v1968_v2  ;;  %v3982_v44 = vld [vmem:[#allocation9 + $0x1e8] sm:$0xff]  ;;  %v1628_v25 = vpop.f32.mrf.mxu3 }
 0x21e   : > { %v2002_v11 = vpack.c.bf16 %v1933_v28, %v1933_v28  ;;  %v1993_v43 = vsel %vm510_vm1, %v1968_v2, 0.0  ;;  %v2025_v38 = vpack.c.bf16 %v1969_v10, %v1969_v10  ;;  %v1643_v19 = vadd.f32 %v1623_v20, %v1521_v47  ;;  %v3990_v10 = vld [vmem:[#allocation9 + $0x228] sm:$0xff] }
 0x21f   : > { %v4974_v0 = vpack.c.b16 %v2079_v3, %v2078_v1  ;;  %v1780_v34 = vadd.f32 %v4903_v9, %v1764_v7  ;;  %v2026_v27 = vpack.c.bf16 %v1993_v43, %v1993_v43  ;;  %v1401_v4 = vadd.f32 %v1384_v12, %v1279_v62  ;;  %v1509_v6 = vpop.f32.mrf.mxu2 }
 0x220   : > { %v2180_v51 = vunpack.c.l.b16 %v2002_v11  ;;  %v2297_v49 = vunpack.c.l.b16 %v2025_v38  ;;  %2899 = vmatpush.bf16.msra.mxu1 %v3982_v44 }
 0x221   : > { %v1871_v54 = vmax.f32 %v1780_v34, 0.0  ;;  %2156 = vmatmul.bf16.vlgmr.msra.gmra.mxu3 %v4974_v0  ;;  %v2298_v13 = vunpack.c.l.b16 %v2026_v27  ;;  %v1523_v47 = vadd.f32 %v1506_v8, %v1401_v4  ;;  %v1387_v34 = vpop.f32.mrf.mxu1 }
 0x222   : > { %v4981_v36 = vpack.c.b16 %v2180_v51, %v2179_v42  ;;  %2681 = vmatpush.bf16.msra.mxu3 %v3968_v59 }
 0x223   : > { %2473 = vmatmul.bf16.vlgmr.msrb.gmra.mxu1 %v4960_v55  ;;  %v4984_v18 = vpack.c.b16 %v2298_v13, %v2297_v49  ;;  %v1934_v40 = vrot.slane %v1871_v54, 7  ;;  %v3992_v55 = vld [vmem:[#allocation9 + $0x238] sm:$0xff]  ;;  %v2015_v24 = vpack.c.bf16 %v1871_v54, %v1871_v54  ;;  %v1970_v50 = vrot.slane %v1871_v54, 1 }
 0x224   : > { %v1745_v57 = vpop.f32.mrf.mxu0  ;;  %2797 = vmatmul.bf16.vlgmr.msrb.gmra.mxu0 %v4981_v36  ;;  %4002 = vmatpush.bf16.msra.mxu2 %v3992_v55  ;;  %v1645_v56 = vadd.f32 %v1628_v25, %v1523_v47 }
 0x225   : > { %v1765_v14 = vadd.f32 %v1745_v57, %v1643_v19  ;;  %3005 = vmatpush.bf16.msra.mxu0 %v3992_v55  ;;  %v1958_v15 = vsel %vm461_vm0, 0.0, %v1934_v40  ;;  %v2080_v45 = vunpack.c.l.b16 %v2015_v24  ;;  %2900 = vmatpush.bf16.msra.mxu1 %v3981_v37  ;;  %v3980_v57 = vld [vmem:[#allocation9 + $0x1d8] sm:$0xff]  ;;  %v1631_v55 = vpop.f32.mrf.mxu3 }
 0x226   : > { %2257 = vmatmul.bf16.gmra.mxu2 %v4981_v36  ;;  %v2003_v30 = vpack.c.bf16 %v1958_v15, %v1958_v15  ;;  %2682 = vmatpush.bf16.msra.mxu3 %v3967_v32  ;;  %v3986_v32 = vld [vmem:[#allocation9 + $0x208] sm:$0xff] }
 0x227   : > { %v1781_v20 = vadd.f32 %v4903_v9, %v1765_v14  ;;  %v1511_v25 = vpop.f32.mrf.mxu2 }
 0x228   : > { %4003 = vmatpush.bf16.msra.mxu2 %v3991_v60  ;;  %v2181_v51 = vunpack.c.l.b16 %v2003_v30 }
 0x229   : > { %v1872_v17 = vmax.f32 %v1781_v20, 0.0  ;;  %3006 = vmatpush.bf16.msra.mxu0 %v3991_v60  ;;  %2901 = vmatpush.bf16.msra.mxu1 %v3980_v57  ;;  %v3979_v20 = vld [vmem:[#allocation9 + $0x1d0] sm:$0xff]  ;;  %v1389_v8 = vpop.f32.mrf.mxu1  ;;  %v3978_v60 = vld [vmem:[#allocation9 + $0x1c8] sm:$0xff] }
 0x22a   : > { %2683 = vmatpush.bf16.msra.mxu3 %v3966_v29  ;;  %v1403_v4 = vadd.f32 %v1389_v8, %v4894_v33  ;;  %v3977_v33 = vld [vmem:[#allocation9 + $0x1c0] sm:$0xff] }
 0x22b   : > { %v1935_v41 = vrot.slane %v1872_v17, 7  ;;  %v1971_v39 = vrot.slane %v1872_v17, 1  ;;  %v2016_v2 = vpack.c.bf16 %v1872_v17, %v1872_v17  ;;  %v1839_v17 = vstv %s1838_s14 }
 0x22c   : > { %v1748_v1 = vpop.f32.mrf.mxu0  ;;  %4004 = vmatpush.bf16.msra.mxu2 %v3990_v10  ;;  %vm5013_vm3 = vcmp.eq.s32.totalorder %v1839_v17, 1 }
 0x22d   : > { %v1766_v28 = vadd.f32 %v1748_v1, %v1644_v53  ;;  %v2081_v3 = vunpack.c.l.b16 %v2016_v2  ;;  %v1936_v7 = vsel %vm461_vm0, %v1934_v40, %v1935_v41  ;;  %v1972_v11 = vsel %vm510_vm1, %v1970_v50, %v1971_v39  ;;  %3007 = vmatpush.bf16.msra.mxu0 %v3990_v10  ;;  %2902 = vmatpush.bf16.msra.mxu1 %v3979_v20  ;;  %v3987_v53 = vld [vmem:[#allocation9 + $0x210] sm:$0xff] }
 0x22e   : > { %v2004_v61 = vpack.c.bf16 %v1936_v7, %v1936_v7  ;;  %v1994_v43 = vsel %vm510_vm1, %v1971_v39, 0.0  ;;  %v2027_v38 = vpack.c.bf16 %v1972_v11, %v1972_v11  ;;  %v1402_v40 = vadd.f32 %v1387_v34, %v4888_v48  ;;  %2684 = vmatpush.bf16.msra.mxu3 %v3965_v21 }
 0x22f   : > { %v1782_v27 = vadd.f32 %v4903_v9, %v1766_v28  ;;  %v4997_v52 = vpack.c.b16 %v2081_v3, %v2080_v45  ;;  %v2028_v42 = vpack.c.bf16 %v1994_v43, %v1994_v43  ;;  %v3961_v45 = vld [vmem:[#allocation9 + $0x140] sm:$0xff] }
 0x230   : > { %v2182_v49 = vunpack.c.l.b16 %v2004_v61  ;;  %v2299_v54 = vunpack.c.l.b16 %v2027_v38  ;;  %4005 = vmatpush.bf16.msra.mxu2 %v3989_v31  ;;  %v1524_v16 = vadd.f32 %v1509_v6, %v1402_v40  ;;  %v1525_v38 = vadd.f32 %v1511_v25, %v1403_v4 }
 0x231   : > { %v1873_v13 = vmax.f32 %v1782_v27, 0.0  ;;  %2161 = vmatmul.bf16.gmra.mxu3 %v4997_v52  ;;  %v2300_v35 = vunpack.c.l.b16 %v2028_v42  ;;  %3008 = vmatpush.bf16.msra.mxu0 %v3989_v31  ;;  %v1633_v42 = vpop.f32.mrf.mxu3 }
 0x232   : > { %v5000_v19 = vpack.c.b16 %v2182_v49, %v2181_v51  ;;  %v1646_v50 = vadd.f32 %v1631_v55, %v1524_v16  ;;  %2903 = vmatpush.bf16.msra.mxu1 %v3978_v60  ;;  %v3548_v51 = vsel %vm5013_vm3, 1.0, %v4392_v58  ;;  %v1647_v57 = vadd.f32 %v1633_v42, %v1525_v38 }
 0x233   : > { %2478 = vmatmul.bf16.gmra.mxu1 %v4981_v36  ;;  %v5003_v12 = vpack.c.b16 %v2300_v35, %v2299_v54  ;;  %v1937_v59 = vrot.slane %v1873_v13, 7  ;;  %v3988_v36 = vld [vmem:[#allocation9 + $0x218] sm:$0xff]  ;;  %v2017_v48 = vpack.c.bf16 %v1873_v13, %v1873_v13  ;;  %v1973_v41 = vrot.slane %v1873_v13, 1 }
 0x234   : > { %v1750_v14 = vpop.f32.mrf.mxu0  ;;  %2802 = vmatmul.bf16.gmra.mxu0 %v5000_v19  ;;  %4006 = vmatpush.bf16.msra.mxu2 %v3988_v36  ;;  %v3964_v35 = vld [vmem:[#allocation9 + $0x158] sm:$0xff] }
 0x235   : > { %v1767_v26 = vadd.f32 %v1750_v14, %v1645_v56  ;;  %v1959_v15 = vsel %vm461_vm0, 0.0, %v1937_v59  ;;  %3009 = vmatpush.bf16.msra.mxu0 %v3988_v36  ;;  %v2521_v28 = vunpack.c.l.b16 %v2017_v48  ;;  %v3985_v56 = vld [vmem:[#allocation9 + $0x200] sm:$0xff]  ;;  %2685 = vmatpush.bf16.msra.mxu3 %v3964_v35 }
 0x236   : > { %2262 = vmatmul.bf16.gmra.mxu2 %v5000_v19  ;;  %v2005_v30 = vpack.c.bf16 %v1959_v15, %v1959_v15  ;;  %2904 = vmatpush.bf16.msra.mxu1 %v3977_v33 }
 0x237   : > { %v1783_v62 = vadd.f32 %v4903_v9, %v1767_v26 }
 0x238   : > { %4007 = vmatpush.bf16.msra.mxu2 %v3987_v53  ;;  %v2413_v49 = vunpack.c.l.b16 %v2005_v30 }
 0x239   : > { %v1874_v24 = vmax.f32 %v1783_v62, 0.0  ;;  %3010 = vmatpush.bf16.msra.mxu0 %v3987_v53  ;;  %2686 = vmatpush.bf16.msra.mxu3 %v3963_v22 }
 0x23b   : > { %v1938_v39 = vrot.slane %v1874_v24, 7  ;;  %v1974_v2 = vrot.slane %v1874_v24, 1  ;;  %v2018_v44 = vpack.c.bf16 %v1874_v24, %v1874_v24 }
 0x23c   : > { %v1753_v1 = vpop.f32.mrf.mxu0  ;;  %4008 = vmatpush.bf16.msra.mxu2 %v3986_v32 }
 0x23d   : > { %v1768_v3 = vadd.f32 %v1753_v1, %v1646_v50  ;;  %v1939_v7 = vsel %vm461_vm0, %v1937_v59, %v1938_v39  ;;  %v2522_v10 = vunpack.c.l.b16 %v2018_v44  ;;  %v1975_v37 = vsel %vm510_vm1, %v1973_v41, %v1974_v2  ;;  %3011 = vmatpush.bf16.msra.mxu0 %v3986_v32  ;;  %v3962_v50 = vld [vmem:[#allocation9 + $0x148] sm:$0xff] }
 0x23e   : > { %v2006_v11 = vpack.c.bf16 %v1939_v7, %v1939_v7  ;;  %v1995_v61 = vsel %vm510_vm1, %v1974_v2, 0.0  ;;  %v2029_v43 = vpack.c.bf16 %v1975_v37, %v1975_v37  ;;  %2687 = vmatpush.bf16.msra.mxu3 %v3962_v50 }
 0x23f   : > { %v1784_v47 = vadd.f32 %v4903_v9, %v1768_v3  ;;  %v5021_v34 = vpack.c.b16 %v2522_v10, %v2521_v28  ;;  %v2030_v27 = vpack.c.bf16 %v1995_v61, %v1995_v61 }
 0x240   : > { %v2414_v54 = vunpack.c.l.b16 %v2006_v11  ;;  %v2629_v13 = vunpack.c.l.b16 %v2029_v43  ;;  %4009 = vmatpush.bf16.msra.mxu2 %v3985_v56 }
 0x241   : > { %v1875_v29 = vmax.f32 %v1784_v47, 0.0  ;;  %2365 = vmatmul.bf16.vlgmr.msrb.gmra.mxu3 %v2301_v63  ;;  %v2630_v6 = vunpack.c.l.b16 %v2030_v27  ;;  %3012 = vmatpush.bf16.msra.mxu0 %v3985_v56 }
 0x242   : > { %v2415_v31 = vpack.c.b16 %v2414_v54, %v2413_v49  ;;  %2688 = vmatpush.bf16.msra.mxu3 %v3961_v45 }
 0x243   : > { %v1911_v40 = vmul.f32 %v3548_v51, %v1875_v29  ;;  %2483 = vmatmul.bf16.gmra.mxu1 %v5000_v19  ;;  %v5030_v58 = vpack.c.b16 %v2630_v6, %v2629_v13 }
 0x244   : > { %v1755_v14 = vpop.f32.mrf.mxu0  ;;  %2807 = vmatmul.bf16.gmra.mxu0 %v2415_v31 }
 0x245   : > { %v1769_v59 = vadd.f32 %v1755_v14, %v1647_v57  ;;  %v1940_v63 = vrot.slane %v1911_v40, 7  ;;  %v2019_v16 = vpack.c.bf16 %v1911_v40, %v1911_v40  ;;  %v1976_v36 = vrot.slane %v1911_v40, 1 }
 0x246   : > { %2581 = vmatmul.bf16.vlgmr.msrb.gmra.mxu2 %v4955_v46 }
 0x247   : > { %v1785_v23 = vadd.f32 %v4903_v9, %v1769_v59  ;;  %v1960_v19 = vsel %vm461_vm0, 0.0, %v1940_v63  ;;  %v2845_v8 = vunpack.c.l.b16 %v2019_v16 }
 0x248   : > { %v2007_v48 = vpack.c.bf16 %v1960_v19, %v1960_v19 }
 0x249   : > { %v1876_v26 = vmax.f32 %v1785_v23, 0.0 }
 0x24a   : > { %v2737_v39 = vunpack.c.l.b16 %v2007_v48 }
 0x24b   : > { %v1912_v55 = vmul.f32 %v3548_v51, %v1876_v26 }
 0x24d   : > { %v1941_v20 = vrot.slane %v1912_v55, 7  ;;  %v2020_v21 = vpack.c.bf16 %v1912_v55, %v1912_v55  ;;  %v1977_v62 = vrot.slane %v1912_v55, 1 }
 0x24f   : > { %v1942_v24 = vsel %vm461_vm0, %v1940_v63, %v1941_v20  ;;  %v2846_v17 = vunpack.c.l.b16 %v2020_v21  ;;  %v1978_v46 = vsel %vm510_vm1, %v1976_v36, %v1977_v62  ;;  %v1996_v9 = vsel %vm510_vm1, %v1977_v62, 0.0 }
 0x250   : > { %v2008_v15 = vpack.c.bf16 %v1942_v24, %v1942_v24  ;;  %v2031_v53 = vpack.c.bf16 %v1978_v46, %v1978_v46  ;;  %v2032_v60 = vpack.c.bf16 %v1996_v9, %v1996_v9 }
 0x251   : > { %2370 = vmatmul.bf16.gmra.mxu3 %v4963_v5  ;;  %v2847_v41 = vpack.c.b16 %v2846_v17, %v2845_v8 }
 0x252   : > { %v2738_v2 = vunpack.c.l.b16 %v2008_v15  ;;  %v2953_v44 = vunpack.c.l.b16 %v2031_v53  ;;  %v2954_v4 = vunpack.c.l.b16 %v2032_v60 }
 0x253   : > { %2488 = vmatmul.bf16.gmra.mxu1 %v2415_v31 }
 0x254   : > { %v2739_v25 = vpack.c.b16 %v2738_v2, %v2737_v39  ;;  %v2955_v1 = vpack.c.b16 %v2954_v4, %v2953_v44 }
 0x256   : > { %2586 = vmatmul.bf16.gmra.mxu2 %v4974_v0  ;;  %2812 = vmatmul.bf16.gmra.mxu0 %v2739_v25 }
 0x261   : > { %2375 = vmatmul.bf16.gmra.mxu3 %v4984_v18 }
 0x263   : > { %2905 = vmatmul.bf16.vlgmr.msra.gmra.mxu1 %v4974_v0 }
 0x266   : > { %2591 = vmatmul.bf16.gmra.mxu2 %v4997_v52  ;;  %3013 = vmatmul.bf16.vlgmr.msra.gmra.mxu0 %v4984_v18 }
 0x271   : > { %2380 = vmatmul.bf16.gmra.mxu3 %v5003_v12 }
 0x273   : > { %2910 = vmatmul.bf16.gmra.mxu1 %v4997_v52 }
 0x276   : > { %2596 = vmatmul.bf16.gmra.mxu2 %v5021_v34 }
 0x280   : > { %v2147_v30 = vpop.f32.mrf.mxu1 }
 0x281   : > { %2689 = vmatmul.bf16.vlgmr.msra.gmra.mxu3 %v4963_v5 }
 0x283   : > { %2915 = vmatmul.bf16.gmra.mxu1 %v5021_v34 }
 0x286   : > { %3018 = vmatmul.bf16.vlgmr.msra.gmra.mxu2 %v5003_v12 }
 0x288   : > { %v2149_v0 = vpop.f32.mrf.mxu1 }
 0x289   : > { %v2248_v28 = vpop.f32.mrf.mxu2 }
 0x28a   : > { %v2249_v3 = vadd.f32 %v2248_v28, %v2147_v30 }
 0x290   : > { %v2152_v10 = vpop.f32.mrf.mxu1 }
 0x291   : > { %v2250_v7 = vpop.f32.mrf.mxu2  ;;  %2694 = vmatmul.bf16.gmra.mxu3 %v4984_v18 }
 0x292   : > { %v2251_v32 = vadd.f32 %v2250_v7, %v2149_v0  ;;  %v5101_v7 = vld [vmem:[%s5228_s7] ss:$0 sm:$0xff] }
 0x293   : > { %2920 = vmatmul.bf16.gmra.mxu1 %v2847_v41 }
 0x296   : > { %3023 = vmatmul.bf16.gmra.mxu2 %v5030_v58 }
 0x298   : > { %v2154_v5 = vpop.f32.mrf.mxu1 }
 0x299   : > { %v2253_v52 = vpop.f32.mrf.mxu2 }
 0x29a   : > { %v5052_v37 = vadd.f32 %v2253_v52, %v2152_v10 }
 0x2a0   : > { %v2474_v38 = vpop.f32.mrf.mxu1 }
 0x2a1   : > { %v2255_v11 = vpop.f32.mrf.mxu2  ;;  %2699 = vmatmul.bf16.gmra.mxu3 %v5003_v12  ;;  %v2798_v54 = vpop.f32.mrf.mxu0 }
 0x2a2   : > { %v5055_v33 = vadd.f32 %v2255_v11, %v2154_v5 }
 0x2a4   : > { %v2157_v61 = vpop.f32.mrf.mxu3 }
 0x2a6   : > { %3028 = vmatmul.bf16.gmra.mxu2 %v2955_v1 }
 0x2a8   : > { %v2476_v42 = vpop.f32.mrf.mxu1 }
 0x2a9   : > { %v2258_v43 = vpop.f32.mrf.mxu2  ;;  %v2800_v31 = vpop.f32.mrf.mxu0 }
 0x2aa   : > { %v5057_v47 = vadd.f32 %v2258_v43, %v2157_v61 }
 0x2ac   : > { %v2159_v18 = vpop.f32.mrf.mxu3 }
 0x2b0   : > { %v2479_v29 = vpop.f32.mrf.mxu1 }
 0x2b1   : > { %v2260_v34 = vpop.f32.mrf.mxu2  ;;  %2704 = vmatmul.bf16.gmra.mxu3 %v5030_v58  ;;  %v2803_v59 = vpop.f32.mrf.mxu0 }
 0x2b2   : > { %v5060_v27 = vadd.f32 %v2260_v34, %v2159_v18 }
 0x2b4   : > { %v2162_v51 = vpop.f32.mrf.mxu3 }
 0x2b8   : > { %v2481_v57 = vpop.f32.mrf.mxu1 }
 0x2b9   : > { %v2263_v49 = vpop.f32.mrf.mxu2  ;;  %v5068_v63 = vpop.f32.mrf.mxu0 }
 0x2ba   : > { %v5062_v13 = vadd.f32 %v2263_v49, %v2162_v51 }
 0x2bc   : > { %v2164_v12 = vpop.f32.mrf.mxu3 }
 0x2c0   : > { %v5066_v22 = vpop.f32.mrf.mxu1 }
 0x2c1   : > { %v2265_v35 = vpop.f32.mrf.mxu2  ;;  %v5072_v36 = vpop.f32.mrf.mxu0 }
 0x2c2   : > { %v5064_v6 = vadd.f32 %v2265_v35, %v2164_v12 }
 0x2c4   : > { %v2366_v56 = vpop.f32.mrf.mxu3 }
 0x2c5   : > { %v2386_v53 = vadd.f32 %v2366_v56, %v2249_v3  ;;  %v3055_v56 = vld [vmem:[%s4556_s21 + $0x8] sm:$0xff] }
 0x2c7   : > { %v2494_v39 = vadd.f32 %v2474_v38, %v2386_v53 }
 0x2c8   : > { %v5070_v16 = vpop.f32.mrf.mxu1 }
 0x2c9   : > { %v2582_v40 = vpop.f32.mrf.mxu2  ;;  %v5078_v48 = vpop.f32.mrf.mxu0 }
 0x2ca   : > { %v2602_v2 = vadd.f32 %v2582_v40, %v2494_v39 }
 0x2cc   : > { %v2368_v14 = vpop.f32.mrf.mxu3 }
 0x2cd   : > { %v2387_v44 = vadd.f32 %v2368_v14, %v2251_v32  ;;  %v3054_v32 = vld [vmem:[%s4556_s21] sm:$0xff] }
 0x2cf   : > { %v2495_v30 = vadd.f32 %v2476_v42, %v2387_v44 }
 0x2d0   : > { %v5074_v21 = vpop.f32.mrf.mxu1 }
 0x2d1   : > { %v2584_v58 = vpop.f32.mrf.mxu2 }
 0x2d2   : > { %v2603_v10 = vadd.f32 %v2584_v58, %v2495_v30 }
 0x2d3   : > { %v5086_v46 = vpop.f32.mrf.mxu0 }
 0x2d4   : > { %v2371_v23 = vpop.f32.mrf.mxu3 }
 0x2d5   : > { %v2388_v52 = vadd.f32 %v2371_v23, %v5052_v37 }
 0x2d7   : > { %v2496_v18 = vadd.f32 %v2479_v29, %v2388_v52 }
 0x2d8   : > { %v5082_v24 = vpop.f32.mrf.mxu1 }
 0x2d9   : > { %v2587_v26 = vpop.f32.mrf.mxu2 }
 0x2da   : > { %v2604_v12 = vadd.f32 %v2587_v26, %v2496_v18 }
 0x2db   : > { %v5094_v41 = vpop.f32.mrf.mxu0 }
 0x2dc   : > { %v2373_v55 = vpop.f32.mrf.mxu3 }
 0x2dd   : > { %v2389_v35 = vadd.f32 %v2373_v55, %v5055_v33  ;;  %v3056_v55 = vld [vmem:[%s4556_s21 + $0x10] sm:$0xff] }
 0x2df   : > { %v2497_v23 = vadd.f32 %v2481_v57, %v2389_v35 }
 0x2e0   : > { %v2906_v15 = vpop.f32.mrf.mxu1 }
 0x2e1   : > { %v2589_v19 = vpop.f32.mrf.mxu2 }
 0x2e3   : > { %v3014_v0 = vpop.f32.mrf.mxu0 }
 0x2e4   : > { %v2376_v20 = vpop.f32.mrf.mxu3 }
 0x2e5   : > { %v2390_v26 = vadd.f32 %v2376_v20, %v5057_v47 }
 0x2e8   : > { %v2908_v4 = vpop.f32.mrf.mxu1 }
 0x2e9   : > { %v5076_v62 = vpop.f32.mrf.mxu2 }
 0x2ec   : > { %v5080_v8 = vpop.f32.mrf.mxu3 }
 0x2ed   : > { %v2391_v47 = vadd.f32 %v5080_v8, %v5060_v27 }
 0x2f0   : > { %v2911_v38 = vpop.f32.mrf.mxu1 }
 0x2f1   : > { %v5084_v17 = vpop.f32.mrf.mxu2 }
 0x2f4   : > { %v5088_v9 = vpop.f32.mrf.mxu3 }
 0x2f5   : > { %v2392_v27 = vadd.f32 %v5088_v9, %v5062_v13 }
 0x2f9   : > { %v5090_v60 = vpop.f32.mrf.mxu2 }
 0x2fc   : > { %v5092_v50 = vpop.f32.mrf.mxu3 }
 0x2fd   : > { %v2393_v9 = vadd.f32 %v5092_v50, %v5064_v6 }
 0x301   : > { %v5096_v45 = vpop.f32.mrf.mxu2 }
 0x304   : > { %v2690_v25 = vpop.f32.mrf.mxu3 }
 0x305   : > { %v2710_v1 = vadd.f32 %v2690_v25, %v2602_v2  ;;  %v2605_v2 = vadd.f32 %v2589_v19, %v2497_v23 }
 0x307   : > { %v2818_v28 = vadd.f32 %v2798_v54, %v2710_v1  ;;  %v3016_v54 = vpop.f32.mrf.mxu0  ;;  %v2498_v1 = vadd.f32 %v5066_v22, %v2390_v26 }
 0x309   : > { %v2926_v3 = vadd.f32 %v2906_v15, %v2818_v28  ;;  %v3019_v51 = vpop.f32.mrf.mxu2  ;;  %v2606_v19 = vadd.f32 %v5076_v62, %v2498_v1 }
 0x30b   : > { %v3034_v5 = vadd.f32 %v3014_v0, %v2926_v3  ;;  %v3057_v3 = vld [vmem:[%s4556_s21 + $0x18] sm:$0xff] }
 0x30c   : > { %v2692_v11 = vpop.f32.mrf.mxu3 }
 0x30d   : > { %v3046_v61 = vadd.f32 %v5101_v7, %v3034_v5  ;;  %v2711_v43 = vadd.f32 %v2692_v11, %v2603_v10  ;;  %v2499_v5 = vadd.f32 %v5070_v16, %v2391_v47 }
 0x30f   : > { %v3062_v34 = vadd.f32 %v3054_v32, %v3046_v61  ;;  %v2819_v42 = vadd.f32 %v2800_v31, %v2711_v43  ;;  %v2913_v31 = vpop.f32.mrf.mxu1  ;;  %v2607_v62 = vadd.f32 %v5084_v17, %v2499_v5  ;;  %v3058_v43 = vld [vmem:[%s4556_s21 + $0x20] sm:$0xff] }
 0x311   : > { %3070 = vst [vmem:[%s4614_s3] sm:$0xff] %v3062_v34  ;;  %v2927_v49 = vadd.f32 %v2908_v4, %v2819_v42  ;;  %v3021_v39 = vpop.f32.mrf.mxu2  ;;  %v2500_v42 = vadd.f32 %v5074_v21, %v2392_v27 }
 0x313   : > { %v3035_v37 = vadd.f32 %v3016_v54, %v2927_v49  ;;  %v2608_v13 = vadd.f32 %v5090_v60, %v2500_v42  ;;  %v3059_v54 = vld [vmem:[%s4556_s21 + $0x28] sm:$0xff] }
 0x314   : > { %v2695_v40 = vpop.f32.mrf.mxu3 }
 0x315   : > { %v3047_v14 = vadd.f32 %v5101_v7, %v3035_v37  ;;  %v2712_v58 = vadd.f32 %v2695_v40, %v2604_v12 }
 0x317   : > { %v3063_v15 = vadd.f32 %v3055_v56, %v3047_v14  ;;  %v2820_v29 = vadd.f32 %v2803_v59, %v2712_v58  ;;  %v2916_v28 = vpop.f32.mrf.mxu1  ;;  %v2501_v56 = vadd.f32 %v5082_v24, %v2393_v9  ;;  %v3060_v58 = vld [vmem:[%s4556_s21 + $0x30] sm:$0xff] }
 0x319   : > { %3071 = vst [vmem:[%s4614_s3 + $0x8] sm:$0xff] %v3063_v15  ;;  %v2928_v53 = vadd.f32 %v2911_v38, %v2820_v29  ;;  %v3024_v0 = vpop.f32.mrf.mxu2  ;;  %v2609_v6 = vadd.f32 %v5096_v45, %v2501_v56 }
 0x31b   : > { %v3036_v33 = vadd.f32 %v3019_v51, %v2928_v53 }
 0x31c   : > { %v2697_v44 = vpop.f32.mrf.mxu3 }
 0x31d   : > { %v3048_v4 = vadd.f32 %v5101_v7, %v3036_v33  ;;  %v2713_v25 = vadd.f32 %v2697_v44, %v2605_v2  ;;  %v3061_v2 = vld [vmem:[%s4556_s21 + $0x38] sm:$0xff] }
 0x31f   : > { %v3064_v57 = vadd.f32 %v3056_v55, %v3048_v4  ;;  %v2821_v59 = vadd.f32 %v5068_v63, %v2713_v25  ;;  %v2918_v61 = vpop.f32.mrf.mxu1 }
 0x321   : > { %3072 = vst [vmem:[%s4614_s3 + $0x10] sm:$0xff] %v3064_v57  ;;  %v2929_v30 = vadd.f32 %v2913_v31, %v2821_v59  ;;  %v3026_v16 = vpop.f32.mrf.mxu2 }
 0x323   : > { %v3037_v20 = vadd.f32 %v3021_v39, %v2929_v30 }
 0x324   : > { %v2700_v10 = vpop.f32.mrf.mxu3 }
 0x325   : > { %v3049_v52 = vadd.f32 %v5101_v7, %v3037_v20  ;;  %v2714_v22 = vadd.f32 %v2700_v10, %v2606_v19 }
 0x327   : > { %v3065_v32 = vadd.f32 %v3057_v3, %v3049_v52  ;;  %v2822_v63 = vadd.f32 %v5072_v36, %v2714_v22  ;;  %v2921_v37 = vpop.f32.mrf.mxu1 }
 0x329   : > { %3073 = vst [vmem:[%s4614_s3 + $0x18] sm:$0xff] %v3065_v32  ;;  %v2930_v11 = vadd.f32 %v2916_v28, %v2822_v63  ;;  %v3029_v60 = vpop.f32.mrf.mxu2 }
 0x32b   : > { %v3038_v8 = vadd.f32 %v3024_v0, %v2930_v11 }
 0x32c   : > { %v2702_v38 = vpop.f32.mrf.mxu3 }
 0x32d   : > { %v3050_v18 = vadd.f32 %v5101_v7, %v3038_v8  ;;  %v2715_v34 = vadd.f32 %v2702_v38, %v2607_v62 }
 0x32f   : > { %v3066_v36 = vadd.f32 %v3058_v43, %v3050_v18  ;;  %v2823_v51 = vadd.f32 %v5078_v48, %v2715_v34  ;;  %v2923_v31 = vpop.f32.mrf.mxu1 }
 0x331   : > { %3074 = vst [vmem:[%s4614_s3 + $0x20] sm:$0xff] %v3066_v36  ;;  %v2931_v17 = vadd.f32 %v2918_v61, %v2823_v51  ;;  %v3031_v53 = vpop.f32.mrf.mxu2 }
 0x333   : > { %v3039_v49 = vadd.f32 %v3026_v16, %v2931_v17 }
 0x334   : > { %v2705_v12 = vpop.f32.mrf.mxu3 }
 0x335   : > { %v3051_v35 = vadd.f32 %v5101_v7, %v3039_v49  ;;  %v2716_v21 = vadd.f32 %v2705_v12, %v2608_v13 }
 0x337   : > { %v3067_v40 = vadd.f32 %v3059_v54, %v3051_v35  ;;  %v2824_v48 = vadd.f32 %v5086_v46, %v2716_v21 }
 0x339   : > { %3075 = vst [vmem:[%s4614_s3 + $0x28] sm:$0xff] %v3067_v40  ;;  %v2932_v14 = vadd.f32 %v2921_v37, %v2824_v48 }
 0x33b   : > { %v3040_v50 = vadd.f32 %v3029_v60, %v2932_v14 }
 0x33c   : > { %v2707_v23 = vpop.f32.mrf.mxu3 }
 0x33d   : > { %v3052_v15 = vadd.f32 %v5101_v7, %v3040_v50  ;;  %v2717_v24 = vadd.f32 %v2707_v23, %v2609_v6 }
 0x33f   : > { %v3068_v46 = vadd.f32 %v3060_v58, %v3052_v15  ;;  %v2825_v29 = vadd.f32 %v5094_v41, %v2717_v24 }
 0x341   : > { %3076 = vst [vmem:[%s4614_s3 + $0x30] sm:$0xff] %v3068_v46  ;;  %v2933_v45 = vadd.f32 %v2923_v31, %v2825_v29 }
 0x343   : > { %v3041_v39 = vadd.f32 %v3031_v53, %v2933_v45 }
 0x345   : > { %v3053_v26 = vadd.f32 %v5101_v7, %v3041_v39 }
 0x347   : > { %v3069_v33 = vadd.f32 %v3061_v2, %v3053_v26 }
 0x349   : > { %3077 = vst [vmem:[%s4614_s3 + $0x38] sm:$0xff] %v3069_v33 }
 0x34a   : > { %4301 = shalt.err (!%p4298_p11)
}
 0x34b   : > { %s4393_s2 = smov 128   ;;  %s4394_s3 = smov 8  }
 0x34c   : > { %4024 = dma.vmem_to_hbm [thread:$0]  (%p4525_p5), %s3095_s6, 1024, %s3097_s5, %s3079_s4, %s4393_s2, %s4393_s2, %s4394_s3  }
 0x34d PF: > { %s5231_s7 = sld [smem:[#allocation22_spill]]  ;;  %p4048_p12 = scmp.ge.s32.totalorder %s4380_s28, 2 }
 0x34f   : > { %p4038_p13 = pnand %p4048_p12, %p4489_p6 }
 0x351   : > { %p4039_p0 = pneg %p4038_p13 }
 0x353   : > { %s3111_s13 = sand.u32 1, %s5231_s7  }
 0x354   : > { %s3112_s29 = scalar_lea.sflag [#allocation6], %s3111_s13 }
 0x355   : > { %4347 = dma.done.wait (%p4039_p0), %s3112_s29, 1024  }
 0x356   : > { %4349 = vsyncadd (%p4039_p0), %s3112_s29, 4294966272  ;;  %s23_s28 = sadd.s32 1, %s4380_s28   ;;  %s5233_s16 = sld [smem:[#allocation24_spill]] }
 0x357   : > { %p20_p3 = scmp.ge.s32.totalorder %s23_s28, 10   ;;  %s5234_s21 = smov %s4356_s22 }
 0x358   : > { %s5235_s22 = smov %s4360_s23  ;;  %s5236_s23 = smov %s4538_s10 }
 0x359   : > { %s5237_s24 = smov %s4372_s26  ;;  %s5238_s25 = smov %s4376_s27 }
 0x35a   : > { %s5240_s27 = smov %s5246_s15  ;;  %22 = sbr.rel (!%p20_p3) target bundleno = 14 (0xe), region = 150 }
 0x35c   : > { %s5239_s26 = smov %s5233_s16 }
 0x35f   :  { %3118 = vsyncpa [#allocation5], 1 }
 0x360   :  { %3120 = vsyncpa [#allocation5 + $0x1], 1 }
 0x361   :  { %3121 = vsyncpa [#allocation8], 1 }
 0x362   :  { %3122 = vsyncpa [#allocation6], 1 }
 0x363   :  { %3124 = vsyncpa [#allocation6 + $0x1], 1 }
 0x364   :  { %3125 = vsyncmov [#allocation3] }
 0x367   :  { %s3126_s8 = vpop.sfrf %3125 }
 0x368   :  { %p3845_p6 = scmp.ne.s32.totalorder %s3126_s8, 0 }
 0x36a   :  { %3130 = shalt.err (%p3845_p6)  }
 0x36b   :  { %3132 = vsyncmov [#allocation3 + $0x1] }
 0x36e   :  { %s3133_s10 = vpop.sfrf %3132 }
 0x36f   :  { %p3846_p5 = scmp.ne.s32.totalorder %s3133_s10, 0 }
 0x371   :  { %3137 = shalt.err (%p3846_p5)  }

</bundles_post_ra>
